<compile_context>
chip_gen: v5e
topology: v5e:2x2
jax: 0.10.0
libtpu: 0.0.40
codegen_flags: <defaults>
</compile_context>

<pallas_src>
import functools

import numpy as np
import jax
import jax.numpy as jnp
from jax.experimental import pallas as pl
from jax.experimental.pallas import tpu as pltpu

HIDDEN = 32
HOPS = (1, 2, 3)
GIN_EPS = 0.0          # torch_geometric GINConv default eps
LANE = 128


def _round_up(a, b):
    return (a + b - 1) // b * b


def _tpu_tuning():
    """Return (preferred row tile, scoped-VMEM cap in bytes) for this TPU generation."""
    try:
        kind = jax.devices()[0].device_kind.lower()
    except Exception:
        kind = ""
    if "v6" in kind:
        return 256, 100 << 20          # 128 MiB physical VMEM, 256-wide MXU
    if "v7" in kind or "7x" in kind or "tpu7" in kind:
        return 256, 56 << 20           # only 64 MiB physical VMEM per TensorCore
    if "v5" in kind:
        return 128, 100 << 20          # 128x128 MXU, 128 MiB physical VMEM
    return 128, 32 << 20               # unknown / older chip: conservative


# ---------------------------------------------------------------------------
# Fused Pallas kernel
# ---------------------------------------------------------------------------
def _mixhop_kernel(adj_ref, x_ref, rep_ref, mask_ref,
                   w1_ref, b1_ref, w2_ref, b2_ref, wout_ref, bout_ref,
                   o_ref, state_ref, *,
                   tile_m, n_pad, num_steps, eps, adj_resident):
    s = pl.program_id(0)                       # hop-application step (outer, sequential)
    i = pl.program_id(1)                       # node row tile        (inner, sequential)
    row0 = pl.multiple_of(i * tile_m, tile_m)

    # Initialize the stacked state S0 = [x | x | x | 0] once, before the first step.
    # (x @ rep is an exact replication: rep holds identity blocks for the real branches
    # and zeros for the padded lane block.)
    @pl.when((s == 0) & (i == 0))
    def _init():
        s0 = jnp.dot(x_ref[...], rep_ref[...], preferred_element_type=jnp.float32)
        state_ref[pl.ds(0, n_pad), :] = s0.astype(state_ref.dtype)

    # Ping-pong halves of the flat (2*Np, C) bf16 state scratch.
    parity = s % 2
    src_base = pl.multiple_of(parity * n_pad, tile_m)
    dst_base = pl.multiple_of((1 - parity) * n_pad, tile_m)

    # GIN aggregation for this row tile: A_tile @ S + (1 + eps) * S_tile.
    # bf16 x bf16 operands go straight to the MXU with f32 accumulation (no upcast).
    if adj_resident:
        a_tile = adj_ref[pl.ds(row0, tile_m), :]                  # (tile_m, Np) bf16
    else:
        a_tile = adj_ref[...]                                     # (tile_m, Np) bf16
    s_all = state_ref[pl.ds(src_base, n_pad), :]                  # (Np, C)     bf16
    h_self = state_ref[pl.ds(src_base + row0, tile_m), :].astype(jnp.float32)
    agg = jnp.dot(a_tile, s_all, preferred_element_type=jnp.float32)
    agg = agg + (1.0 + eps) * h_self

    # All three branch MLPs at once via block-diagonal (C, C) weights (lane-dense).
    z = jnp.dot(agg, w1_ref[...], preferred_element_type=jnp.float32) + b1_ref[...]
    z = jnp.maximum(z, 0.0)
    h_new = jnp.dot(z, w2_ref[...], preferred_element_type=jnp.float32) + b2_ref[...]

    # Freeze branches whose hop budget is exhausted (per-step column mask); the padded
    # lane block is always masked off and stays zero.
    m = mask_ref[...]                                             # (1, C)
    new_tile = m * h_new + (1.0 - m) * h_self
    state_ref[pl.ds(dst_base + row0, tile_m), :] = new_tile.astype(state_ref.dtype)

    # Last step: out_proj(concat(h_a, h_b, h_c)) written into the VMEM-resident output
    # block (flushed to HBM exactly once at the end of the grid).
    @pl.when(s == num_steps - 1)
    def _emit():
        o_ref[pl.ds(row0, tile_m), :] = (
            jnp.dot(new_tile, wout_ref[...], preferred_element_type=jnp.float32)
            + bout_ref[...]).astype(o_ref.dtype)


# ---------------------------------------------------------------------------
# Parameters & wrapper
# ---------------------------------------------------------------------------
def init_params(key, hidden=HIDDEN, hops=HOPS):
    params = {"convs": [], "hops": tuple(hops)}
    for _ in hops:
        key, k1, k2, k3, k4 = jax.random.split(key, 5)
        w1 = jax.random.normal(k1, (hidden, hidden), jnp.float32) * 0.1   # (in, out)
        b1 = jax.random.normal(k2, (1, hidden), jnp.float32) * 0.1
        w2 = jax.random.normal(k3, (hidden, hidden), jnp.float32) * 0.1
        b2 = jax.random.normal(k4, (1, hidden), jnp.float32) * 0.1
        params["convs"].append((w1, b1, w2, b2))
    key, k5, k6 = jax.random.split(key, 3)
    params["out_w"] = jax.random.normal(k5, (hidden * len(hops), hidden), jnp.float32) * 0.1
    params["out_b"] = jax.random.normal(k6, (1, hidden), jnp.float32) * 0.1
    return params


def mixhop_forward(params, x, edge_index, *, tile_m=None, force_stream=False):
    n, hid = x.shape
    hops = params["hops"]
    nb = len(hops)
    num_steps = max(hops)
    c_real = hid * nb
    c = _round_up(c_real, LANE)            # 96 -> 128: lane-dense state / MXU tiles

    pref_tile, vmem_cap = _tpu_tuning()
    if tile_m is None:
        tile_m = pref_tile
    n_pad = _round_up(max(n, tile_m), tile_m)
    n_tiles = n_pad // tile_m

    # Dense adjacency A[dst, src] += 1 (GIN sum aggregation of source features at dst),
    # stored in bf16 (integer multiplicities <= 256 are exact in bf16). Padded rows /
    # columns are zero, so padded nodes never influence real nodes.
    # TODO(synk): for large sparse graphs build a CSR layout and do a gather /
    #             segment-sum aggregation instead of this O(Np^2) densification.
    src_i, dst_i = edge_index[0], edge_index[1]
    adj = jnp.zeros((n_pad, n_pad), jnp.float32).at[dst_i, src_i].add(1.0)
    adj = adj.astype(jnp.bfloat16)

    x_pad = jnp.zeros((n_pad, hid), jnp.float32).at[:n, :].set(x.astype(jnp.float32))

    # Replication matrix: x @ rep == [x | x | x | 0]  (identity blocks, zero lane pad).
    rep_np = np.zeros((hid, c), np.float32)
    for j in range(nb):
        rep_np[:, j * hid:(j + 1) * hid] = np.eye(hid, dtype=np.float32)
    rep = jnp.asarray(rep_np)

    # Per-step column mask: branch j keeps updating while hops[j] > step (0-based);
    # the padded lane block is always frozen at zero.
    mask_np = np.zeros((num_steps, 1, c), np.float32)
    for st in range(num_steps):
        for j, hop in enumerate(hops):
            if hop > st:
                mask_np[st, 0, j * hid:(j + 1) * hid] = 1.0
    mask = jnp.asarray(mask_np)

    # Block-diagonal branch MLP weights (zero extra block keeps padded lanes at zero).
    w1_bd = jnp.zeros((c, c), jnp.float32)
    w2_bd = jnp.zeros((c, c), jnp.float32)
    b1_cat = jnp.zeros((1, c), jnp.float32)
    b2_cat = jnp.zeros((1, c), jnp.float32)
    for j, (w1, b1, w2, b2) in enumerate(params["convs"]):
        sl = slice(j * hid, (j + 1) * hid)
        w1_bd = w1_bd.at[sl, sl].set(w1)
        w2_bd = w2_bd.at[sl, sl].set(w2)
        b1_cat = b1_cat.at[:, sl].set(b1)
        b2_cat = b2_cat.at[:, sl].set(b2)
    w_out = jnp.zeros((c, hid), jnp.float32).at[:c_real, :].set(params["out_w"])
    b_out = params["out_b"]

    # --- VMEM budgeting: keep A resident when it fits, else stream row tiles. -------
    def _vmem_bytes(resident):
        bf16, f32 = 2, 4
        adj_b = (2 * n_pad * n_pad if resident else 2 * tile_m * n_pad) * bf16
        state_b = 2 * n_pad * c * bf16                      # flat ping-pong scratch
        io_b = 2 * n_pad * hid * f32 * 2                    # resident x + resident out
        const_b = 2 * (hid * c + 2 * c * c + 2 * c + c * hid + hid + num_steps * c) * f32
        return adj_b + state_b + io_b + const_b

    adj_resident = (not force_stream) and (_vmem_bytes(True) + (4 << 20) <= vmem_cap)
    vmem_limit = int(min(vmem_cap, max(_vmem_bytes(adj_resident) + (4 << 20), 16 << 20)))

    if adj_resident:
        adj_spec = pl.BlockSpec((n_pad, n_pad), lambda s, i: (0, 0))      # resident A
    else:
        adj_spec = pl.BlockSpec((tile_m, n_pad), lambda s, i: (i, 0))     # streamed A

    kernel = functools.partial(
        _mixhop_kernel, tile_m=tile_m, n_pad=n_pad, num_steps=num_steps,
        eps=GIN_EPS, adj_resident=adj_resident)

    flops = num_steps * (2 * n_pad * n_pad * c + 4 * n_pad * c * c) + 2 * n_pad * c * hid
    adj_reads = 1 if adj_resident else num_steps
    bytes_accessed = (adj_reads * n_pad * n_pad * 2            # bf16 adjacency
                      + n_pad * hid * 4                        # x
                      + (hid * c + 2 * c * c + 2 * c + c * hid + hid + num_steps * c) * 4
                      + n_pad * hid * 4)                       # output, written once

    out = pl.pallas_call(
        kernel,
        out_shape=jax.ShapeDtypeStruct((n_pad, hid), jnp.float32),
        grid_spec=pltpu.PrefetchScalarGridSpec(
            num_scalar_prefetch=0,
            grid=(num_steps, n_tiles),
            in_specs=[
                adj_spec,                                               # A
                pl.BlockSpec((n_pad, hid), lambda s, i: (0, 0)),        # x (resident)
                pl.BlockSpec((hid, c), lambda s, i: (0, 0)),            # replication mat
                pl.BlockSpec((None, 1, c), lambda s, i: (s, 0, 0)),     # per-step mask
                pl.BlockSpec((c, c), lambda s, i: (0, 0)),              # W1 block-diag
                pl.BlockSpec((1, c), lambda s, i: (0, 0)),              # b1
                pl.BlockSpec((c, c), lambda s, i: (0, 0)),              # W2 block-diag
                pl.BlockSpec((1, c), lambda s, i: (0, 0)),              # b2
                pl.BlockSpec((c, hid), lambda s, i: (0, 0)),            # out_proj W
                pl.BlockSpec((1, hid), lambda s, i: (0, 0)),            # out_proj b
            ],
            # VMEM-resident output block, flushed to HBM exactly once at grid end.
            out_specs=pl.BlockSpec((n_pad, hid), lambda s, i: (0, 0)),
            scratch_shapes=[
                pltpu.VMEM((2 * n_pad, c), jnp.bfloat16),   # flat ping-pong state
            ],
        ),
        compiler_params=pltpu.CompilerParams(
            # Every row tile of step s must finish before step s+1 reads the ping-pong
            # state -> both grid axes are sequential on a single core.
            dimension_semantics=("arbitrary", "arbitrary"),
            vmem_limit_bytes=vmem_limit,
        ),
        cost_estimate=pl.CostEstimate(flops=flops, transcendentals=0,
                                      bytes_accessed=bytes_accessed),
    )(adj, x_pad, rep, mask, w1_bd, b1_cat, w2_bd, b2_cat, w_out, b_out)

    return out[:n]


# ---------------------------------------------------------------------------
# Pure-JAX reference (literal translation of the PyTorch module) for self-check
# ---------------------------------------------------------------------------
def mixhop_reference(params, x, edge_index):
    n = x.shape[0]
    src, dst = edge_index[0], edge_index[1]
    adj = jnp.zeros((n, n), jnp.float32).at[dst, src].add(1.0)
    outs = []
    for hop, (w1, b1, w2, b2) in zip(params["hops"], params["convs"]):
        h = x
        for _ in range(hop):
            agg = adj @ h + (1.0 + GIN_EPS) * h
            h = jnp.maximum(agg @ w1 + b1, 0.0) @ w2 + b2
        outs.append(h)
    cat = jnp.concatenate(outs, axis=-1)
    return cat @ params["out_w"] + params["out_b"]


def _make_graph(kx, ks, kd, n, n_extra):
    x = jax.random.normal(kx, (n, HIDDEN), jnp.float32)
    idx = jnp.arange(n, dtype=jnp.int32)
    ring_src = jnp.concatenate([idx, (idx + 1) % n])
    ring_dst = jnp.concatenate([(idx + 1) % n, idx])
    rnd_src = jax.random.randint(ks, (n_extra,), 0, n, dtype=jnp.int32)
    rnd_dst = jax.random.randint(kd, (n_extra,), 0, n, dtype=jnp.int32)
    edge_index = jnp.stack([jnp.concatenate([ring_src, rnd_src]),
                            jnp.concatenate([ring_dst, rnd_dst])], axis=0)
    return x, edge_index


# ---------------------------------------------------------------------------
if __name__ == "__main__":
    key = jax.random.PRNGKey(0)
    k_param, k_x1, k_s1, k_d1, k_x2, k_s2, k_d2 = jax.random.split(key, 7)
    params = init_params(k_param)

    # Case 1: small graph -> resident-adjacency fast path (A read from HBM only once).
    x1, ei1 = _make_graph(k_x1, k_s1, k_d1, 256, 512)
    fwd1 = jax.jit(lambda xx, ei: mixhop_forward(params, xx, ei))
    out1 = jax.block_until_ready(fwd1(x1, ei1))
    assert out1.shape == (256, HIDDEN), out1.shape
    err1 = float(jnp.max(jnp.abs(out1 - mixhop_reference(params, x1, ei1))))
    assert err1 < 5e-2, f"resident-adjacency path mismatch: max abs err = {err1}"

    # Case 2: forced streamed-adjacency path with several row tiles (exercises the
    # ping-pong state across tiles and the per-step A row-tile pipeline).
    x2, ei2 = _make_graph(k_x2, k_s2, k_d2, 384, 768)
    fwd2 = jax.jit(lambda xx, ei: mixhop_forward(params, xx, ei,
                                                 tile_m=128, force_stream=True))
    out2 = jax.block_until_ready(fwd2(x2, ei2))
    assert out2.shape == (384, HIDDEN), out2.shape
    err2 = float(jnp.max(jnp.abs(out2 - mixhop_reference(params, x2, ei2))))
    assert err2 < 5e-2, f"streamed-adjacency path mismatch: max abs err = {err2}"

    print("KERNEL_OK")
</pallas_src>

<mosaic_0001>
module attributes {stable_mosaic.version = 11 : i64} {
  func.func @_mixhop_kernel(%arg0: i32, %arg1: i32, %arg2: memref<256x256xbf16, #tpu.memory_space<vmem>>, %arg3: memref<256x32xf32, #tpu.memory_space<vmem>>, %arg4: memref<32x128xf32, #tpu.memory_space<vmem>>, %arg5: memref<1x1x128xf32, #tpu.memory_space<vmem>>, %arg6: memref<128x128xf32, #tpu.memory_space<vmem>>, %arg7: memref<1x128xf32, #tpu.memory_space<vmem>>, %arg8: memref<128x128xf32, #tpu.memory_space<vmem>>, %arg9: memref<1x128xf32, #tpu.memory_space<vmem>>, %arg10: memref<128x32xf32, #tpu.memory_space<vmem>>, %arg11: memref<1x32xf32, #tpu.memory_space<vmem>>, %arg12: memref<256x32xf32, #tpu.memory_space<vmem>>, %arg13: memref<512x128xbf16, #tpu.memory_space<vmem>>) attributes {dimension_semantics = [#tpu.dimension_semantics<arbitrary>, #tpu.dimension_semantics<arbitrary>], iteration_bounds = array<i64: 3, 2>, scalar_prefetch = 0 : i64, scratch_operands = 1 : i64, tpu.core_type = #tpu.core_type<tc>, window_params = [{pipeline_mode = #tpu.pipeline_mode<synchronous>, transform_indices = @transform_0, window_bounds = array<i64: 256, 256>}, {pipeline_mode = #tpu.pipeline_mode<synchronous>, transform_indices = @transform_1, window_bounds = array<i64: 256, 32>}, {pipeline_mode = #tpu.pipeline_mode<synchronous>, transform_indices = @transform_2, window_bounds = array<i64: 32, 128>}, {transform_indices = @transform_3, window_bounds = array<i64: 1, 1, 128>}, {pipeline_mode = #tpu.pipeline_mode<synchronous>, transform_indices = @transform_4, window_bounds = array<i64: 128, 128>}, {pipeline_mode = #tpu.pipeline_mode<synchronous>, transform_indices = @transform_5, window_bounds = array<i64: 1, 128>}, {pipeline_mode = #tpu.pipeline_mode<synchronous>, transform_indices = @transform_6, window_bounds = array<i64: 128, 128>}, {pipeline_mode = #tpu.pipeline_mode<synchronous>, transform_indices = @transform_7, window_bounds = array<i64: 1, 128>}, {pipeline_mode = #tpu.pipeline_mode<synchronous>, transform_indices = @transform_8, window_bounds = array<i64: 128, 32>}, {pipeline_mode = #tpu.pipeline_mode<synchronous>, transform_indices = @transform_9, window_bounds = array<i64: 1, 32>}, {pipeline_mode = #tpu.pipeline_mode<synchronous>, transform_indices = @transform_10, window_bounds = array<i64: 256, 32>}]} {
    %c128_i32 = arith.constant 128 : i32
    %0 = arith.muli %arg1, %c128_i32 : i32
    %1 = tpu.assume_multiple %0, 128 : i32
    %c0_i32 = arith.constant 0 : i32
    %2 = arith.cmpi eq, %arg0, %c0_i32 : i32
    %c0_i32_0 = arith.constant 0 : i32
    %3 = arith.cmpi eq, %arg1, %c0_i32_0 : i32
    %4 = arith.andi %2, %3 : i1
    %5 = arith.extui %4 : i1 to i32
    %c0_i32_1 = arith.constant 0 : i32
    %6 = arith.cmpi ne, %5, %c0_i32_1 : i32
    scf.if %6 {
      %c0_29 = arith.constant 0 : index
      %c0_30 = arith.constant 0 : index
      %62 = vector.load %arg3[%c0_29, %c0_30] : memref<256x32xf32, #tpu.memory_space<vmem>>, vector<256x32xf32>
      %c0_31 = arith.constant 0 : index
      %c0_32 = arith.constant 0 : index
      %63 = vector.load %arg4[%c0_31, %c0_32] : memref<32x128xf32, #tpu.memory_space<vmem>>, vector<32x128xf32>
      %cst_33 = arith.constant dense<0.000000e+00> : vector<256x128xf32>
      %64 = tpu.matmul %62, %63, %cst_33 {dimension_numbers = #tpu.dot_dimension_numbers<[1], [0], [0], [1], [0, 0, 1, 1], [], []>} : vector<256x32xf32>, vector<32x128xf32>, vector<256x128xf32> -> vector<256x128xf32>
      %65 = arith.truncf %64 : vector<256x128xf32> to vector<256x128xbf16>
      %c0_34 = arith.constant 0 : index
      %c0_35 = arith.constant 0 : index
      %66 = vector.load %arg13[%c0_34, %c0_35] : memref<512x128xbf16, #tpu.memory_space<vmem>>, vector<256x128xbf16>
      tpu.vector_store %arg13[%c0_34, %c0_35], %65 {strides = array<i32>} : memref<512x128xbf16, #tpu.memory_space<vmem>>, vector<256x128xbf16>,
    } else {
    }
    %c2_i32 = arith.constant 2 : i32
    %c0_i32_2 = arith.constant 0 : i32
    %7 = arith.cmpi eq, %c2_i32, %c0_i32_2 : i32
    %c1_i32 = arith.constant 1 : i32
    %8 = arith.select %7, %c1_i32, %c2_i32 : i32
    %9 = arith.remsi %arg0, %8 : i32
    %c0_i32_3 = arith.constant 0 : i32
    %10 = arith.cmpi ne, %9, %c0_i32_3 : i32
    %c0_i32_4 = arith.constant 0 : i32
    %11 = arith.cmpi slt, %9, %c0_i32_4 : i32
    %c0_i32_5 = arith.constant 0 : i32
    %12 = arith.cmpi slt, %8, %c0_i32_5 : i32
    %13 = arith.xori %11, %12 : i1
    %14 = arith.andi %13, %10 : i1
    %15 = arith.addi %9, %8 : i32
    %16 = arith.select %14, %15, %9 : i32
    %c256_i32 = arith.constant 256 : i32
    %17 = arith.muli %16, %c256_i32 : i32
    %18 = tpu.assume_multiple %17, 128 : i32
    %c1_i32_6 = arith.constant 1 : i32
    %19 = arith.subi %c1_i32_6, %16 : i32
    %c256_i32_7 = arith.constant 256 : i32
    %20 = arith.muli %19, %c256_i32_7 : i32
    %21 = tpu.assume_multiple %20, 128 : i32
    %22 = arith.index_cast %1 : i32 to index
    %c0 = arith.constant 0 : index
    %23 = vector.load %arg2[%22, %c0] : memref<256x256xbf16, #tpu.memory_space<vmem>>, vector<128x256xbf16>
    %24 = arith.index_cast %18 : i32 to index
    %c0_8 = arith.constant 0 : index
    %25 = vector.load %arg13[%24, %c0_8] : memref<512x128xbf16, #tpu.memory_space<vmem>>, vector<256x128xbf16>
    %26 = arith.addi %18, %1 : i32
    %27 = arith.index_cast %26 : i32 to index
    %c0_9 = arith.constant 0 : index
    %28 = vector.load %arg13[%27, %c0_9] : memref<512x128xbf16, #tpu.memory_space<vmem>>, vector<128x128xbf16>
    %29 = arith.extf %28 : vector<128x128xbf16> to vector<128x128xf32>
    %cst = arith.constant dense<0.000000e+00> : vector<128x128xf32>
    %30 = tpu.matmul %23, %25, %cst {dimension_numbers = #tpu.dot_dimension_numbers<[1], [0], [0], [1], [0, 0, 1, 1], [], []>} : vector<128x256xbf16>, vector<256x128xbf16>, vector<128x128xf32> -> vector<128x128xf32>
    %cst_10 = arith.constant 1.000000e+00 : f32
    %31 = vector.broadcast %cst_10 : f32 to vector<128x128xf32>
    %32 = arith.mulf %31, %29 : vector<128x128xf32>
    %33 = arith.addf %30, %32 : vector<128x128xf32>
    %c0_11 = arith.constant 0 : index
    %c0_12 = arith.constant 0 : index
    %34 = vector.load %arg6[%c0_11, %c0_12] : memref<128x128xf32, #tpu.memory_space<vmem>>, vector<128x128xf32>
    %cst_13 = arith.constant dense<0.000000e+00> : vector<128x128xf32>
    %35 = tpu.matmul %33, %34, %cst_13 {dimension_numbers = #tpu.dot_dimension_numbers<[1], [0], [0], [1], [0, 0, 1, 1], [], []>} : vector<128x128xf32>, vector<128x128xf32>, vector<128x128xf32> -> vector<128x128xf32>
    %c0_14 = arith.constant 0 : index
    %c0_15 = arith.constant 0 : index
    %36 = vector.load %arg7[%c0_14, %c0_15] : memref<1x128xf32, #tpu.memory_space<vmem>>, vector<1x128xf32>
    %37 = vector.broadcast %36 : vector<1x128xf32> to vector<128x128xf32>
    %38 = arith.addf %35, %37 : vector<128x128xf32>
    %cst_16 = arith.constant 0.000000e+00 : f32
    %39 = vector.broadcast %cst_16 : f32 to vector<128x128xf32>
    %40 = arith.maximumf %38, %39 : vector<128x128xf32>
    %c0_17 = arith.constant 0 : index
    %c0_18 = arith.constant 0 : index
    %41 = vector.load %arg8[%c0_17, %c0_18] : memref<128x128xf32, #tpu.memory_space<vmem>>, vector<128x128xf32>
    %cst_19 = arith.constant dense<0.000000e+00> : vector<128x128xf32>
    %42 = tpu.matmul %40, %41, %cst_19 {dimension_numbers = #tpu.dot_dimension_numbers<[1], [0], [0], [1], [0, 0, 1, 1], [], []>} : vector<128x128xf32>, vector<128x128xf32>, vector<128x128xf32> -> vector<128x128xf32>
    %c0_20 = arith.constant 0 : index
    %c0_21 = arith.constant 0 : index
    %43 = vector.load %arg9[%c0_20, %c0_21] : memref<1x128xf32, #tpu.memory_space<vmem>>, vector<1x128xf32>
    %44 = vector.broadcast %43 : vector<1x128xf32> to vector<128x128xf32>
    %45 = arith.addf %42, %44 : vector<128x128xf32>
    %c0_22 = arith.constant 0 : index
    %c0_23 = arith.constant 0 : index
    %c0_24 = arith.constant 0 : index
    %46 = vector.load %arg5[%c0_22, %c0_23, %c0_24] : memref<1x1x128xf32, #tpu.memory_space<vmem>>, vector<1x1x128xf32>
    %47 = vector.shape_cast %46 : vector<1x1x128xf32> to vector<1x128xf32>
    %48 = vector.broadcast %47 : vector<1x128xf32> to vector<128x128xf32>
    %49 = arith.mulf %48, %45 : vector<128x128xf32>
    %cst_25 = arith.constant 1.000000e+00 : f32
    %50 = vector.broadcast %cst_25 : f32 to vector<1x128xf32>
    %51 = arith.subf %50, %47 : vector<1x128xf32>
    %52 = vector.broadcast %51 : vector<1x128xf32> to vector<128x128xf32>
    %53 = arith.mulf %52, %29 : vector<128x128xf32>
    %54 = arith.addf %49, %53 : vector<128x128xf32>
    %55 = arith.truncf %54 : vector<128x128xf32> to vector<128x128xbf16>
    %56 = arith.addi %21, %1 : i32
    %57 = arith.index_cast %56 : i32 to index
    %c0_26 = arith.constant 0 : index
    %58 = vector.load %arg13[%57, %c0_26] : memref<512x128xbf16, #tpu.memory_space<vmem>>, vector<128x128xbf16>
    tpu.vector_store %arg13[%57, %c0_26], %55 {strides = array<i32>} : memref<512x128xbf16, #tpu.memory_space<vmem>>, vector<128x128xbf16>,
    %c2_i32_27 = arith.constant 2 : i32
    %59 = arith.cmpi eq, %arg0, %c2_i32_27 : i32
    %60 = arith.extui %59 : i1 to i32
    %c0_i32_28 = arith.constant 0 : i32
    %61 = arith.cmpi ne, %60, %c0_i32_28 : i32
    scf.if %61 {
      %c0_29 = arith.constant 0 : index
      %c0_30 = arith.constant 0 : index
      %62 = vector.load %arg10[%c0_29, %c0_30] : memref<128x32xf32, #tpu.memory_space<vmem>>, vector<128x32xf32>
      %cst_31 = arith.constant dense<0.000000e+00> : vector<128x32xf32>
      %63 = tpu.matmul %54, %62, %cst_31 {dimension_numbers = #tpu.dot_dimension_numbers<[1], [0], [0], [1], [0, 0, 1, 1], [], []>} : vector<128x128xf32>, vector<128x32xf32>, vector<128x32xf32> -> vector<128x32xf32>
      %c0_32 = arith.constant 0 : index
      %c0_33 = arith.constant 0 : index
      %64 = vector.load %arg11[%c0_32, %c0_33] : memref<1x32xf32, #tpu.memory_space<vmem>>, vector<1x32xf32>
      %65 = vector.broadcast %64 : vector<1x32xf32> to vector<128x32xf32>
      %66 = arith.addf %63, %65 : vector<128x32xf32>
      %67 = arith.index_cast %1 : i32 to index
      %c0_34 = arith.constant 0 : index
      %68 = vector.load %arg12[%67, %c0_34] : memref<256x32xf32, #tpu.memory_space<vmem>>, vector<128x32xf32>
      tpu.vector_store %arg12[%67, %c0_34], %66 {strides = array<i32>} : memref<256x32xf32, #tpu.memory_space<vmem>>, vector<128x32xf32>,
    } else {
    }
    return
  }
  func.func @transform_0(%arg0: i32, %arg1: i32) -> (i32, i32) {
    %c0_i32 = arith.constant 0 : i32
    %c0_i32_0 = arith.constant 0 : i32
    %c0_i32_1 = arith.constant 0 : i32
    return %c0_i32, %c0_i32_0 : i32, i32
  }
  func.func @transform_1(%arg0: i32, %arg1: i32) -> (i32, i32) {
    %c0_i32 = arith.constant 0 : i32
    %c0_i32_0 = arith.constant 0 : i32
    %c0_i32_1 = arith.constant 0 : i32
    return %c0_i32, %c0_i32_0 : i32, i32
  }
  func.func @transform_2(%arg0: i32, %arg1: i32) -> (i32, i32) {
    %c0_i32 = arith.constant 0 : i32
    %c0_i32_0 = arith.constant 0 : i32
    %c0_i32_1 = arith.constant 0 : i32
    return %c0_i32, %c0_i32_0 : i32, i32
  }
  func.func @transform_3(%arg0: i32, %arg1: i32) -> (i32, i32, i32) {
    %c0_i32 = arith.constant 0 : i32
    %c0_i32_0 = arith.constant 0 : i32
    %c0_i32_1 = arith.constant 0 : i32
    return %arg0, %c0_i32, %c0_i32_0 : i32, i32, i32
  }
  func.func @transform_4(%arg0: i32, %arg1: i32) -> (i32, i32) {
    %c0_i32 = arith.constant 0 : i32
    %c0_i32_0 = arith.constant 0 : i32
    %c0_i32_1 = arith.constant 0 : i32
    return %c0_i32, %c0_i32_0 : i32, i32
  }
  func.func @transform_5(%arg0: i32, %arg1: i32) -> (i32, i32) {
    %c0_i32 = arith.constant 0 : i32
    %c0_i32_0 = arith.constant 0 : i32
    %c0_i32_1 = arith.constant 0 : i32
    return %c0_i32, %c0_i32_0 : i32, i32
  }
  func.func @transform_6(%arg0: i32, %arg1: i32) -> (i32, i32) {
    %c0_i32 = arith.constant 0 : i32
    %c0_i32_0 = arith.constant 0 : i32
    %c0_i32_1 = arith.constant 0 : i32
    return %c0_i32, %c0_i32_0 : i32, i32
  }
  func.func @transform_7(%arg0: i32, %arg1: i32) -> (i32, i32) {
    %c0_i32 = arith.constant 0 : i32
    %c0_i32_0 = arith.constant 0 : i32
    %c0_i32_1 = arith.constant 0 : i32
    return %c0_i32, %c0_i32_0 : i32, i32
  }
  func.func @transform_8(%arg0: i32, %arg1: i32) -> (i32, i32) {
    %c0_i32 = arith.constant 0 : i32
    %c0_i32_0 = arith.constant 0 : i32
    %c0_i32_1 = arith.constant 0 : i32
    return %c0_i32, %c0_i32_0 : i32, i32
  }
  func.func @transform_9(%arg0: i32, %arg1: i32) -> (i32, i32) {
    %c0_i32 = arith.constant 0 : i32
    %c0_i32_0 = arith.constant 0 : i32
    %c0_i32_1 = arith.constant 0 : i32
    return %c0_i32, %c0_i32_0 : i32, i32
  }
  func.func @transform_10(%arg0: i32, %arg1: i32) -> (i32, i32) {
    %c0_i32 = arith.constant 0 : i32
    %c0_i32_0 = arith.constant 0 : i32
    %c0_i32_1 = arith.constant 0 : i32
    return %c0_i32, %c0_i32_0 : i32, i32
  }
}

</mosaic_0001>

<bundles_post_ra>
// kernel: _lambda_.1
= control target key start
LH: loop header
LB: loop body
LE: loop exit
PB: predicated region body
PF: predicated region fallthrough
CT: control target
= control target key end

     0   :  { %s2074_s13 = smov 0   ;;  %s2076_s14 = smov 0   ;;  %s2768_s0 = inlined_call_operand.vmem [shape: bf16[256,256], index: 0, kind: input, shape index: {}]   ;;  %s2769_s1 = inlined_call_operand.vmem [shape: f32[256,32], index: 1, kind: input, shape index: {}]   ;;  %s2770_s2 = inlined_call_operand.vmem [shape: f32[32,128], index: 2, kind: input, shape index: {}]   ;;  %s2771_s3 = inlined_call_operand.vmem [shape: f32[3,1,128], index: 3, kind: input, shape index: {}]   ;;  %s2772_s4 = inlined_call_operand.vmem [shape: f32[128,128], index: 4, kind: input, shape index: {}]   ;;  %s2773_s5 = inlined_call_operand.vmem [shape: f32[1,128], index: 5, kind: input, shape index: {}]   ;;  %s2774_s6 = inlined_call_operand.vmem [shape: f32[128,128], index: 6, kind: input, shape index: {}]   ;;  %s2775_s7 = inlined_call_operand.vmem [shape: f32[1,128], index: 7, kind: input, shape index: {}]   ;;  %s2776_s8 = inlined_call_operand.vmem [shape: f32[128,32], index: 8, kind: input, shape index: {}]   ;;  %s2777_s9 = inlined_call_operand.vmem [shape: f32[1,32], index: 9, kind: input, shape index: {}]   ;;  %s2778_s10 = inlined_call_operand.vmem [shape: f32[256,32], index: 10, kind: output, shape index: {}]  }
   0x1   :  { %s2078_s15 = smov 0   ;;  %s2080_s16 = smov 0  }
   0x2   :  { %s2082_s17 = smov 0  }
   0x3 LB: > { %s29_s18 = sadd.s32 1, %s2009_s15  ;;  %s32_s19 = sadd.s32 1, %s2013_s16  ;;  %s2017_s17 = sphi %s2082_s17, %s20_s17   ;;  %s2013_s16 = sphi %s2080_s16, %s2784_s16   ;;  %s2009_s15 = sphi %s2078_s15, %s2783_s15   ;;  %s2005_s14 = sphi %s2076_s14, %s2782_s14   ;;  %s2001_s13 = sphi %s2074_s13, %s2781_s13  }
   0x4   : > { %p30_p0 = scmp.ge.s32.totalorder %s29_s18, 2  ;;  %p1486_p1 = scmp.ge.s32.totalorder %s2017_s17, 1 }
   0x5   : > { %p317_p2 = scmp.lt.s32.totalorder %s2017_s17, 7 }
   0x6   : > { %s2786_s18 = smov (%p30_p0, %s29_s18), 0  ;;  %s2788_s19 = smov (!%p30_p0, %s32_s19), %s2013_s16 }
   0x7   : > { %p318_p3 = pnand %p1486_p1, %p317_p2  ;;  %p34_p4 = scmp.ge.s32.totalorder %s2788_s19, 3 }
   0x8   : > { %p348_p5 = scmp.lt.s32.totalorder (!%p318_p3), %s2005_s14, 2  ;;  %s2107_s20 = sshll.u32 (!%p318_p3), %s2001_s13, 7 }
   0x9   : > { %s2790_s19 = smov (%p34_p4, %s2788_s19), 0  ;;  %321 = sbr.rel (%p318_p3) target bundleno = 985 (0x3d9), region = 60 }
   0xa   : > { %p352_p6 = scmp.eq.s32.totalorder (!%p318_p3), %s2005_s14, 0  ;;  %p353_p7 = scmp.eq.s32.totalorder (!%p318_p3), %s2001_s13, 0 }
   0xc   : > { %p354_p8 = pnand (!%p318_p3), %p353_p7, %p352_p6 }
   0xe   : > { %s349_s21 = scalar_select %p348_p5, %s2005_s14, 2 }
   0xf   : > { %357 = sbr.rel (%p354_p8) target bundleno = 222 (0xde), region = 64 }
  0x10   : > { %s2114_s24 = scalar_lea.vmem %s2771_s3, %s349_s21 }
  0x14   : > { %v393_v0 = vld [vmem:[%s2770_s2 + $0x18] sm:$0xff]  ;;  %v392_v1 = vld [vmem:[%s2770_s2 + $0x10] sm:$0xff]  ;;  %v391_v2 = vld [vmem:[%s2770_s2 + $0x8] sm:$0xff]  ;;  %vm394_vm0 = vcmask 261120  }
  0x15   : > { %503 = vmatpush.msra.mxu0 %v393_v0  ;;  %1875 = vmatpush.msra.mxu1 %v393_v0  ;;  %v390_v3 = vld [vmem:[%s2770_s2] sm:$0xff]  ;;  %v359_v8 = vld [vmem:[%s2769_s1 + $0x8] sm:$0xff]  ;;  %v360_v12 = vld [vmem:[%s2769_s1 + $0x10] sm:$0xff] }
  0x16   : > { %1876 = vmatpush.msra.mxu2 %v393_v0  ;;  %1877 = vmatpush.msra.mxu3 %v393_v0  ;;  %v358_v4 = vld [vmem:[%s2769_s1] sm:$0xff]  ;;  %v367_v9 = vld [vmem:[%s2769_s1 + $0x48] sm:$0xff]  ;;  %v368_v13 = vld [vmem:[%s2769_s1 + $0x50] sm:$0xff] }
  0x17   : > { %504 = vmatpush.msra.mxu0 %v392_v1  ;;  %1878 = vmatpush.msra.mxu1 %v392_v1  ;;  %v366_v5 = vld [vmem:[%s2769_s1 + $0x40] sm:$0xff]  ;;  %v375_v10 = vld [vmem:[%s2769_s1 + $0x88] sm:$0xff]  ;;  %v376_v14 = vld [vmem:[%s2769_s1 + $0x90] sm:$0xff] }
  0x18   : > { %1879 = vmatpush.msra.mxu2 %v392_v1  ;;  %1880 = vmatpush.msra.mxu3 %v392_v1  ;;  %v374_v6 = vld [vmem:[%s2769_s1 + $0x80] sm:$0xff]  ;;  %v383_v11 = vld [vmem:[%s2769_s1 + $0xc8] sm:$0xff]  ;;  %v384_v15 = vld [vmem:[%s2769_s1 + $0xd0] sm:$0xff] }
  0x19   : > { %505 = vmatpush.msra.mxu0 %v391_v2  ;;  %1881 = vmatpush.msra.mxu1 %v391_v2  ;;  %v382_v7 = vld [vmem:[%s2769_s1 + $0xc0] sm:$0xff]  ;;  %v361_v16 = vld [vmem:[%s2769_s1 + $0x18] sm:$0xff]  ;;  %v363_v24 = vld [vmem:[%s2769_s1 + $0x28] sm:$0xff] }
  0x1a   : > { %1882 = vmatpush.msra.mxu2 %v391_v2  ;;  %1883 = vmatpush.msra.mxu3 %v391_v2  ;;  %v369_v17 = vld [vmem:[%s2769_s1 + $0x58] sm:$0xff]  ;;  %v362_v20 = vld [vmem:[%s2769_s1 + $0x20] sm:$0xff]  ;;  %v371_v25 = vld [vmem:[%s2769_s1 + $0x68] sm:$0xff] }
  0x1b   : > { %506 = vmatpush.msra.mxu0 %v390_v3  ;;  %1884 = vmatpush.msra.mxu1 %v390_v3  ;;  %v377_v18 = vld [vmem:[%s2769_s1 + $0x98] sm:$0xff]  ;;  %v370_v21 = vld [vmem:[%s2769_s1 + $0x60] sm:$0xff]  ;;  %v379_v26 = vld [vmem:[%s2769_s1 + $0xa8] sm:$0xff] }
  0x1c   : > { %1885 = vmatpush.msra.mxu2 %v390_v3  ;;  %1886 = vmatpush.msra.mxu3 %v390_v3  ;;  %v385_v19 = vld [vmem:[%s2769_s1 + $0xd8] sm:$0xff]  ;;  %v378_v22 = vld [vmem:[%s2769_s1 + $0xa0] sm:$0xff]  ;;  %v387_v27 = vld [vmem:[%s2769_s1 + $0xe8] sm:$0xff] }
  0x1d   : > { %1488 = vmatmul.msk.f32.vlgmr.msra.gmra.mxu0 %vm394_vm0, %v358_v4  ;;  %1496 = vmatmul.msk.f32.vlgmr.msra.gmra.mxu1 %vm394_vm0, %v366_v5  ;;  %v386_v23 = vld [vmem:[%s2769_s1 + $0xe0] sm:$0xff]  ;;  %v364_v28 = vld [vmem:[%s2769_s1 + $0x30] sm:$0xff]  ;;  %v365_v32 = vld [vmem:[%s2769_s1 + $0x38] sm:$0xff] }
  0x1e   : > { %1504 = vmatmul.msk.f32.vlgmr.msra.gmra.mxu2 %vm394_vm0, %v374_v6  ;;  %1512 = vmatmul.msk.f32.vlgmr.msra.gmra.mxu3 %vm394_vm0, %v382_v7  ;;  %v372_v29 = vld [vmem:[%s2769_s1 + $0x70] sm:$0xff]  ;;  %v373_v33 = vld [vmem:[%s2769_s1 + $0x78] sm:$0xff] }
  0x1f   : > { %v380_v30 = vld [vmem:[%s2769_s1 + $0xb0] sm:$0xff]  ;;  %v381_v34 = vld [vmem:[%s2769_s1 + $0xb8] sm:$0xff] }
  0x20   : > { %v388_v31 = vld [vmem:[%s2769_s1 + $0xf0] sm:$0xff]  ;;  %v389_v35 = vld [vmem:[%s2769_s1 + $0xf8] sm:$0xff] }
  0x25   : > { %1489 = vmatmul.msk.f32.gmra.mxu0 %vm394_vm0, %v359_v8  ;;  %1497 = vmatmul.msk.f32.gmra.mxu1 %vm394_vm0, %v367_v9 }
  0x26   : > { %1505 = vmatmul.msk.f32.gmra.mxu2 %vm394_vm0, %v375_v10  ;;  %1513 = vmatmul.msk.f32.gmra.mxu3 %vm394_vm0, %v383_v11 }
  0x2d   : > { %1490 = vmatmul.msk.f32.gmra.mxu0 %vm394_vm0, %v360_v12  ;;  %1498 = vmatmul.msk.f32.gmra.mxu1 %vm394_vm0, %v368_v13 }
  0x2e   : > { %1506 = vmatmul.msk.f32.gmra.mxu2 %vm394_vm0, %v376_v14  ;;  %1514 = vmatmul.msk.f32.gmra.mxu3 %vm394_vm0, %v384_v15 }
  0x35   : > { %1491 = vmatmul.msk.f32.gmra.mxu0 %vm394_vm0, %v361_v16  ;;  %1499 = vmatmul.msk.f32.gmra.mxu1 %vm394_vm0, %v369_v17 }
  0x36   : > { %1507 = vmatmul.msk.f32.gmra.mxu2 %vm394_vm0, %v377_v18  ;;  %1515 = vmatmul.msk.f32.gmra.mxu3 %vm394_vm0, %v385_v19 }
  0x3d   : > { %1492 = vmatmul.msk.f32.gmra.mxu0 %vm394_vm0, %v362_v20  ;;  %1500 = vmatmul.msk.f32.gmra.mxu1 %vm394_vm0, %v370_v21 }
  0x3e   : > { %1508 = vmatmul.msk.f32.gmra.mxu2 %vm394_vm0, %v378_v22  ;;  %1516 = vmatmul.msk.f32.gmra.mxu3 %vm394_vm0, %v386_v23 }
  0x45   : > { %1493 = vmatmul.msk.f32.gmra.mxu0 %vm394_vm0, %v363_v24  ;;  %1501 = vmatmul.msk.f32.gmra.mxu1 %vm394_vm0, %v371_v25 }
  0x46   : > { %1509 = vmatmul.msk.f32.gmra.mxu2 %vm394_vm0, %v379_v26  ;;  %1517 = vmatmul.msk.f32.gmra.mxu3 %vm394_vm0, %v387_v27 }
  0x4d   : > { %1494 = vmatmul.msk.f32.gmra.mxu0 %vm394_vm0, %v364_v28  ;;  %1502 = vmatmul.msk.f32.gmra.mxu1 %vm394_vm0, %v372_v29 }
  0x4e   : > { %1510 = vmatmul.msk.f32.gmra.mxu2 %vm394_vm0, %v380_v30  ;;  %1518 = vmatmul.msk.f32.gmra.mxu3 %vm394_vm0, %v388_v31 }
  0x55   : > { %1495 = vmatmul.msk.f32.gmra.mxu0 %vm394_vm0, %v365_v32  ;;  %1503 = vmatmul.msk.f32.gmra.mxu1 %vm394_vm0, %v373_v33 }
  0x56   : > { %1511 = vmatmul.msk.f32.gmra.mxu2 %vm394_vm0, %v381_v34  ;;  %1519 = vmatmul.msk.f32.gmra.mxu3 %vm394_vm0, %v389_v35 }
  0x9a   : > { %v508_v36 = vpop.f32.mrf.mxu0  ;;  %v532_v37 = vpop.f32.mrf.mxu1 }
  0xa1   : > { %v556_v38 = vpop.f32.mrf.mxu2  ;;  %v580_v39 = vpop.f32.mrf.mxu3 }
  0xa2   : > { %v511_v40 = vpop.f32.mrf.mxu0  ;;  %v535_v41 = vpop.f32.mrf.mxu1 }
  0xa3   : > { %v1697_v42 = vpack.c.bf16 %v511_v40, %v508_v36  ;;  %v1717_v43 = vpack.c.bf16 %v535_v41, %v532_v37 }
  0xa5   : > { %1698 = vst [vmem:[#allocation2] sm:$0xff] %v1697_v42  }
  0xa6   : > { %1849 = vst [vmem:[#allocation2 + $0x20] sm:$0xff] %v1717_v43  }
  0xa9   : > { %v559_v44 = vpop.f32.mrf.mxu2  ;;  %v583_v45 = vpop.f32.mrf.mxu3 }
  0xaa   : > { %v1737_v46 = vpack.c.bf16 %v559_v44, %v556_v38  ;;  %v1757_v47 = vpack.c.bf16 %v583_v45, %v580_v39  ;;  %v514_v48 = vpop.f32.mrf.mxu0  ;;  %v538_v49 = vpop.f32.mrf.mxu1 }
  0xac   : > { %1853 = vst [vmem:[#allocation2 + $0x40] sm:$0xff] %v1737_v46  }
  0xad   : > { %1857 = vst [vmem:[#allocation2 + $0x60] sm:$0xff] %v1757_v47  }
  0xb1   : > { %v562_v50 = vpop.f32.mrf.mxu2  ;;  %v586_v51 = vpop.f32.mrf.mxu3 }
  0xb2   : > { %v517_v52 = vpop.f32.mrf.mxu0  ;;  %v541_v53 = vpop.f32.mrf.mxu1 }
  0xb3   : > { %v1702_v54 = vpack.c.bf16 %v517_v52, %v514_v48  ;;  %v1722_v55 = vpack.c.bf16 %v541_v53, %v538_v49 }
  0xb5   : > { %1846 = vst [vmem:[#allocation2 + $0x8] sm:$0xff] %v1702_v54  }
  0xb6   : > { %1850 = vst [vmem:[#allocation2 + $0x28] sm:$0xff] %v1722_v55  }
  0xb9   : > { %v565_v56 = vpop.f32.mrf.mxu2  ;;  %v589_v57 = vpop.f32.mrf.mxu3 }
  0xba   : > { %v1742_v58 = vpack.c.bf16 %v565_v56, %v562_v50  ;;  %v1762_v59 = vpack.c.bf16 %v589_v57, %v586_v51  ;;  %v520_v60 = vpop.f32.mrf.mxu0  ;;  %v544_v61 = vpop.f32.mrf.mxu1 }
  0xbc   : > { %1854 = vst [vmem:[#allocation2 + $0x48] sm:$0xff] %v1742_v58  }
  0xbd   : > { %1858 = vst [vmem:[#allocation2 + $0x68] sm:$0xff] %v1762_v59  }
  0xc1   : > { %v568_v62 = vpop.f32.mrf.mxu2  ;;  %v592_v63 = vpop.f32.mrf.mxu3 }
  0xc2   : > { %v523_v0 = vpop.f32.mrf.mxu0  ;;  %v547_v1 = vpop.f32.mrf.mxu1 }
  0xc3   : > { %v1707_v2 = vpack.c.bf16 %v523_v0, %v520_v60  ;;  %v1727_v3 = vpack.c.bf16 %v547_v1, %v544_v61 }
  0xc5   : > { %1847 = vst [vmem:[#allocation2 + $0x10] sm:$0xff] %v1707_v2  }
  0xc6   : > { %1851 = vst [vmem:[#allocation2 + $0x30] sm:$0xff] %v1727_v3  }
  0xc9   : > { %v571_v4 = vpop.f32.mrf.mxu2  ;;  %v595_v5 = vpop.f32.mrf.mxu3 }
  0xca   : > { %v1747_v6 = vpack.c.bf16 %v571_v4, %v568_v62  ;;  %v1767_v7 = vpack.c.bf16 %v595_v5, %v592_v63  ;;  %v526_v8 = vpop.f32.mrf.mxu0  ;;  %v550_v9 = vpop.f32.mrf.mxu1 }
  0xcc   : > { %1855 = vst [vmem:[#allocation2 + $0x50] sm:$0xff] %v1747_v6  }
  0xcd   : > { %1859 = vst [vmem:[#allocation2 + $0x70] sm:$0xff] %v1767_v7  }
  0xd1   : > { %v574_v10 = vpop.f32.mrf.mxu2  ;;  %v598_v11 = vpop.f32.mrf.mxu3 }
  0xd2   : > { %v529_v12 = vpop.f32.mrf.mxu0  ;;  %v553_v13 = vpop.f32.mrf.mxu1 }
  0xd3   : > { %v1712_v14 = vpack.c.bf16 %v529_v12, %v526_v8  ;;  %v1732_v15 = vpack.c.bf16 %v553_v13, %v550_v9 }
  0xd5   : > { %1848 = vst [vmem:[#allocation2 + $0x18] sm:$0xff] %v1712_v14  }
  0xd6   : > { %1852 = vst [vmem:[#allocation2 + $0x38] sm:$0xff] %v1732_v15  }
  0xd9   : > { %v577_v16 = vpop.f32.mrf.mxu2  ;;  %v601_v17 = vpop.f32.mrf.mxu3 }
  0xda   : > { %v1752_v18 = vpack.c.bf16 %v577_v16, %v574_v10  ;;  %v1772_v19 = vpack.c.bf16 %v601_v17, %v598_v11 }
  0xdc   : > { %1856 = vst [vmem:[#allocation2 + $0x58] sm:$0xff] %v1752_v18  }
  0xdd   : > { %1860 = vst [vmem:[#allocation2 + $0x78] sm:$0xff] %v1772_v19  }
  0xde PF: > { %p668_p9 = scmp.lt.s32.totalorder %s2005_s14, 0  ;;  %s669_s25 = ssub.s32 0, %s2005_s14  ;;  %v1066_v2 = vld [vmem:[%s2772_s4 + $0x78] sm:$0xff]  ;;  %v1065_v3 = vld [vmem:[%s2772_s4 + $0x70] sm:$0xff]  ;;  %v1064_v4 = vld [vmem:[%s2772_s4 + $0x68] sm:$0xff] }
  0xdf   : > { %s1520_s26 = smin.u32 %s2005_s14, %s669_s25  ;;  %s2284_s23 = scalar_lea.vmem %s2768_s0, %s2107_s20  ;;  %1071 = vmatpush.msra.mxu2 %v1066_v2  ;;  %v1063_v5 = vld [vmem:[%s2772_s4 + $0x60] sm:$0xff]  ;;  %v1062_v6 = vld [vmem:[%s2772_s4 + $0x58] sm:$0xff]  ;;  %v1061_v8 = vld [vmem:[%s2772_s4 + $0x50] sm:$0xff] }
  0xe0   : > { %s671_s27 = sand.u32 1, %s1520_s26   ;;  %v1531_v34 = vld [vmem:[%s2284_s23] sm:$0xf]  ;;  %v1663_v35 = vld [vmem:[%s2284_s23 + $0x4] sm:$0xf0]  ;;  %v1058_v16 = vld [vmem:[%s2772_s4 + $0x38] sm:$0xff] }
  0xe1   : > { %s672_s28 = ssub.s32 0, %s671_s27  ;;  %v1662_v36 = vld [vmem:[%s2284_s23 + $0x4] sm:$0xf]  ;;  %v1533_v39 = vld [vmem:[%s2284_s23 + $0x8] sm:$0xf0]  ;;  %v1532_v40 = vor.u32 %v1663_v35, %v1531_v34  ;;  %1072 = vmatpush.msra.mxu2 %v1065_v3  ;;  %v1057_v17 = vld [vmem:[%s2772_s4 + $0x30] sm:$0xff] }
  0xe2   : > { %s2792_s28 = smov (!%p668_p9, %s672_s28), %s671_s27  ;;  %v1536_v41 = vor.u32 %v1662_v36, %v1533_v39  ;;  %v1539_v42 = vld [vmem:[%s2284_s23 + $0x10] sm:$0xf]  ;;  %v1665_v43 = vld [vmem:[%s2284_s23 + $0x14] sm:$0xf0]  ;;  %v1664_v44 = vld [vmem:[%s2284_s23 + $0x14] sm:$0xf] }
  0xe3   : > { %p1522_p10 = scmp.lt.s32.totalorder %s2792_s28, 0  ;;  %s678_s29 = sadd.s32 2, %s2792_s28  ;;  %v1541_v45 = vld [vmem:[%s2284_s23 + $0x18] sm:$0xf0]  ;;  %v1540_v46 = vor.u32 %v1665_v43, %v1539_v42  ;;  %v1547_v48 = vld [vmem:[%s2284_s23 + $0x20] sm:$0xf]  ;;  %1073 = vmatpush.msra.mxu2 %v1064_v4 }
  0xe4   : > { %v1544_v47 = vor.u32 %v1664_v44, %v1541_v45  ;;  %v1667_v49 = vld [vmem:[%s2284_s23 + $0x24] sm:$0xf0]  ;;  %v1666_v50 = vld [vmem:[%s2284_s23 + $0x24] sm:$0xf]  ;;  %v1549_v51 = vld [vmem:[%s2284_s23 + $0x28] sm:$0xf0] }
  0xe5   : > { %s2794_s29 = smov (!%p1522_p10, %s678_s29), %s2792_s28  ;;  %v1548_v52 = vor.u32 %v1667_v49, %v1547_v48  ;;  %v1552_v53 = vor.u32 %v1666_v50, %v1549_v51  ;;  %v1555_v54 = vld [vmem:[%s2284_s23 + $0x30] sm:$0xf]  ;;  %v1669_v55 = vld [vmem:[%s2284_s23 + $0x34] sm:$0xf0]  ;;  %v1668_v56 = vld [vmem:[%s2284_s23 + $0x34] sm:$0xf]  ;;  %1074 = vmatpush.msra.mxu2 %v1063_v5 }
  0xe6   : > { %s2779_s30 = sshll.u32 %s2794_s29, 8  ;;  %v1557_v57 = vld [vmem:[%s2284_s23 + $0x38] sm:$0xf0]  ;;  %v1556_v58 = vor.u32 %v1669_v55, %v1555_v54  ;;  %v1563_v60 = vld [vmem:[%s2284_s23 + $0x40] sm:$0xf]  ;;  %v1060_v12 = vld [vmem:[%s2772_s4 + $0x48] sm:$0xff] }
  0xe7   : > { %s704_s11 = sshra.s32 %s2779_s30, 3  ;;  %v1560_v59 = vor.u32 %v1668_v56, %v1557_v57  ;;  %v1671_v61 = vld [vmem:[%s2284_s23 + $0x44] sm:$0xf0]  ;;  %v1670_v62 = vld [vmem:[%s2284_s23 + $0x44] sm:$0xf]  ;;  %1075 = vmatpush.msra.mxu2 %v1062_v6  ;;  %s2780_s27 = sshll.u32 %s2794_s29, 8 }
  0xe8   : > { %s1527_s12 = sshll.u32 %s704_s11, 2  ;;  %v1565_v63 = vld [vmem:[%s2284_s23 + $0x48] sm:$0xf0]  ;;  %v1564_v0 = vor.u32 %v1671_v61, %v1563_v60  ;;  %v1571_v7 = vld [vmem:[%s2284_s23 + $0x50] sm:$0xf]  ;;  %v1059_v15 = vld [vmem:[%s2772_s4 + $0x40] sm:$0xff]  ;;  %s740_s28 = sadd.s32 %s2780_s27, %s2107_s20 }
  0xe9   : > { %s2264_s13 = scalar_lea.vmem [#allocation2], %s1527_s12  ;;  %v1568_v1 = vor.u32 %v1670_v62, %v1565_v63  ;;  %v1673_v9 = vld [vmem:[%s2284_s23 + $0x54] sm:$0xf0]  ;;  %v1672_v10 = vld [vmem:[%s2284_s23 + $0x54] sm:$0xf]  ;;  %1076 = vmatpush.msra.mxu2 %v1061_v8  ;;  %v1056_v18 = vld [vmem:[%s2772_s4 + $0x28] sm:$0xff] }
  0xea   : > { %v1685_v20 = vld [vmem:[%s2264_s13 + $0x38] sm:$0xff]  ;;  %v1684_v22 = vld [vmem:[%s2264_s13 + $0x30] sm:$0xff]  ;;  %v1683_v24 = vld [vmem:[%s2264_s13 + $0x28] sm:$0xff]  ;;  %v1572_v13 = vor.u32 %v1673_v9, %v1571_v7  ;;  %s741_s30 = sshra.s32 %s740_s28, 3  ;;  %s681_s22 = ssub.s32 1, %s2794_s29 }
  0xeb   : > { %v1693_v21 = vld [vmem:[%s2264_s13 + $0x78] sm:$0xff]  ;;  %953 = vmatpush.bf16.msra.mxu0 %v1685_v20  ;;  %v1692_v23 = vld [vmem:[%s2264_s13 + $0x70] sm:$0xff]  ;;  %v1691_v25 = vld [vmem:[%s2264_s13 + $0x68] sm:$0xff]  ;;  %1077 = vmatpush.msra.mxu2 %v1060_v12  ;;  %s1528_s11 = sshll.u32 %s741_s30, 2  ;;  %s1524_s27 = sshll.u32 %s681_s22, 8 }
  0xec   : > { %1002 = vmatpush.bf16.msra.mxu1 %v1693_v21  ;;  %v1682_v26 = vld [vmem:[%s2264_s13 + $0x20] sm:$0xff]  ;;  %v1681_v28 = vld [vmem:[%s2264_s13 + $0x18] sm:$0xff]  ;;  %v1680_v30 = vld [vmem:[%s2264_s13 + $0x10] sm:$0xff]  ;;  %s2371_s12 = scalar_lea.vmem [#allocation2], %s1528_s11  ;;  %s1309_s28 = sadd.s32 %s1524_s27, %s2107_s20 }
  0xed   : > { %v1690_v27 = vld [vmem:[%s2264_s13 + $0x60] sm:$0xff]  ;;  %v1689_v29 = vld [vmem:[%s2264_s13 + $0x58] sm:$0xff]  ;;  %v1688_v31 = vld [vmem:[%s2264_s13 + $0x50] sm:$0xff]  ;;  %1078 = vmatpush.msra.mxu2 %v1059_v15  ;;  %s1310_s30 = sshra.s32 %s1309_s28, 3  ;;  %p1658_p11 = scmp.ne.s32.totalorder %s2005_s14, 2 }
  0xee   : > { %v1679_v32 = vld [vmem:[%s2264_s13 + $0x8] sm:$0xff]  ;;  %v1678_v37 = vld [vmem:[%s2264_s13] sm:$0xff]  ;;  %v1573_v11 = vld [vmem:[%s2284_s23 + $0x58] sm:$0xf0]  ;;  %s1657_s29 = sshll.u32 %s1310_s30, 2  ;;  %s2719_s26 = scalar_lea.vmem (!%p1658_p11), %s2778_s10, %s2107_s20 }
  0xef   : > { %954 = vmatpush.bf16.msra.mxu0 %v1684_v22  ;;  %v1687_v33 = vld [vmem:[%s2264_s13 + $0x48] sm:$0xff]  ;;  %v1686_v38 = vld [vmem:[%s2264_s13 + $0x40] sm:$0xff]  ;;  %v1576_v14 = vor.u32 %v1672_v10, %v1573_v11  ;;  %1079 = vmatpush.msra.mxu2 %v1058_v16  ;;  %v1054_v21 = vld [vmem:[%s2772_s4 + $0x18] sm:$0xff] }
  0xf0   : > { %1003 = vmatpush.bf16.msra.mxu1 %v1692_v23  ;;  %v1055_v19 = vld [vmem:[%s2772_s4 + $0x20] sm:$0xff]  ;;  %v1675_v22 = vld [vmem:[%s2284_s23 + $0x64] sm:$0xf0]  ;;  %v2392_v57 = vld [vmem:[%s2371_s12 + $0x10] sm:$0xff]  }
  0xf1   : > { %1080 = vmatpush.msra.mxu2 %v1057_v17  ;;  %v1579_v20 = vld [vmem:[%s2284_s23 + $0x60] sm:$0xf]  ;;  %v1674_v23 = vld [vmem:[%s2284_s23 + $0x64] sm:$0xf]  ;;  %v2401_v4 = vld [vmem:[%s2371_s12 + $0x18] sm:$0xff]  }
  0xf2   : > { %v2374_v36 = vld [vmem:[%s2371_s12] sm:$0xff]   ;;  %v1788_v6 = vunpack.c.l.bf16 %v2401_v4  ;;  %v1789_v11 = vunpack.c.h.bf16 %v2401_v4 }
  0xf3   : > { %955 = vmatpush.bf16.msra.mxu0 %v1683_v24  ;;  %1081 = vmatpush.msra.mxu2 %v1056_v18  ;;  %v1581_v24 = vld [vmem:[%s2284_s23 + $0x68] sm:$0xf0]  ;;  %v1777_v42 = vunpack.c.h.bf16 %v2374_v36  ;;  %v2410_v15 = vld [vmem:[%s2371_s12 + $0x20] sm:$0xff]  }
  0xf4   : > { %1004 = vmatpush.bf16.msra.mxu1 %v1691_v25  ;;  %v1580_v25 = vor.u32 %v1675_v22, %v1579_v20  ;;  %v1792_v17 = vunpack.c.l.bf16 %v2410_v15  ;;  %v1793_v22 = vunpack.c.h.bf16 %v2410_v15 }
  0xf5   : > { %1082 = vmatpush.msra.mxu2 %v1055_v19 }
  0xf7   : > { %956 = vmatpush.bf16.msra.mxu0 %v1682_v26  ;;  %1083 = vmatpush.msra.mxu2 %v1054_v21  ;;  %v1584_v26 = vor.u32 %v1674_v23, %v1581_v24 }
  0xf8   : > { %1005 = vmatpush.bf16.msra.mxu1 %v1690_v27  ;;  %v1053_v27 = vld [vmem:[%s2772_s4 + $0x10] sm:$0xff] }
  0xf9   : > { %1084 = vmatpush.msra.mxu2 %v1053_v27 }
  0xfb   : > { %957 = vmatpush.bf16.msra.mxu0 %v1681_v28  ;;  %v1052_v28 = vld [vmem:[%s2772_s4 + $0x8] sm:$0xff] }
  0xfc   : > { %1006 = vmatpush.bf16.msra.mxu1 %v1689_v29  ;;  %1085 = vmatpush.msra.mxu2 %v1052_v28  ;;  %v1051_v29 = vld [vmem:[%s2772_s4] sm:$0xff] }
  0xfe   : > { %1086 = vmatpush.msra.mxu2 %v1051_v29  ;;  %v1167_v29 = vld [vmem:[%s2774_s6 + $0x78] sm:$0xff] }
  0xff   : > { %958 = vmatpush.bf16.msra.mxu0 %v1680_v30  ;;  %v1587_v30 = vld [vmem:[%s2284_s23 + $0x70] sm:$0xf]  ;;  %1172 = vmatpush.msra.mxu3 %v1167_v29  ;;  %v1975_v29 = vld [vmem:[%s2773_s5] ss:$0 sm:$0xff] }
 0x100   : > { %1007 = vmatpush.bf16.msra.mxu1 %v1688_v31  ;;  %v1677_v31 = vld [vmem:[%s2284_s23 + $0x74] sm:$0xf0] }
 0x101   : > { %v1588_v34 = vor.u32 %v1677_v31, %v1587_v30  ;;  %v1166_v30 = vld [vmem:[%s2774_s6 + $0x70] sm:$0xff] }
 0x102   : > { %1173 = vmatpush.msra.mxu3 %v1166_v30 }
 0x103   : > { %959 = vmatpush.bf16.msra.mxu0 %v1679_v32  ;;  %v1676_v32 = vld [vmem:[%s2284_s23 + $0x74] sm:$0xf] }
 0x104   : > { %1008 = vmatpush.bf16.msra.mxu1 %v1687_v33  ;;  %v1589_v33 = vld [vmem:[%s2284_s23 + $0x78] sm:$0xf0] }
 0x105   : > { %v1592_v35 = vor.u32 %v1676_v32, %v1589_v33 }
 0x107   : > { %960 = vmatpush.bf16.msra.mxu0 %v1678_v37  ;;  %v1776_v37 = vunpack.c.l.bf16 %v2374_v36 }
 0x108   : > { %1009 = vmatpush.bf16.msra.mxu1 %v1686_v38 }
 0x10a   : > { %961 = vmatmul.bf16.vlgmr.msra.gmra.mxu0 %v1532_v40 }
 0x10b   : > { %1010 = vmatmul.bf16.vlgmr.msra.gmra.mxu1 %v1536_v41 }
 0x11a   : > { %966 = vmatmul.bf16.gmra.mxu0 %v1540_v46  ;;  %v2383_v46 = vld [vmem:[%s2371_s12 + $0x8] sm:$0xff]  }
 0x11b   : > { %1015 = vmatmul.bf16.gmra.mxu1 %v1544_v47  ;;  %v1780_v48 = vunpack.c.l.bf16 %v2383_v46 }
 0x12a   : > { %971 = vmatmul.bf16.gmra.mxu0 %v1548_v52 }
 0x12b   : > { %1020 = vmatmul.bf16.gmra.mxu1 %v1552_v53  ;;  %v1781_v53 = vunpack.c.h.bf16 %v2383_v46 }
 0x13a   : > { %976 = vmatmul.bf16.gmra.mxu0 %v1556_v58 }
 0x13b   : > { %1025 = vmatmul.bf16.gmra.mxu1 %v1560_v59  ;;  %v1784_v59 = vunpack.c.l.bf16 %v2392_v57 }
 0x14a   : > { %981 = vmatmul.bf16.gmra.mxu0 %v1564_v0  ;;  %v1785_v0 = vunpack.c.h.bf16 %v2392_v57 }
 0x14b   : > { %1030 = vmatmul.bf16.gmra.mxu1 %v1568_v1 }
 0x15a   : > { %986 = vmatmul.bf16.gmra.mxu0 %v1572_v13 }
 0x15b   : > { %1035 = vmatmul.bf16.gmra.mxu1 %v1576_v14 }
 0x16a   : > { %991 = vmatmul.bf16.gmra.mxu0 %v1580_v25 }
 0x16b   : > { %1040 = vmatmul.bf16.gmra.mxu1 %v1584_v26  ;;  %v2419_v26 = vld [vmem:[%s2371_s12 + $0x28] sm:$0xff]  }
 0x16c   : > { %v1796_v28 = vunpack.c.l.bf16 %v2419_v26 }
 0x17a   : > { %996 = vmatmul.bf16.gmra.mxu0 %v1588_v34  ;;  %v1165_v34 = vld [vmem:[%s2774_s6 + $0x68] sm:$0xff] }
 0x17b   : > { %1045 = vmatmul.bf16.gmra.mxu1 %v1592_v35  ;;  %1174 = vmatpush.msra.mxu3 %v1165_v34 }
 0x187   : > { %v962_v38 = vpop.f32.mrf.mxu0 }
 0x188   : > { %v1011_v39 = vpop.f32.mrf.mxu1  ;;  %v963_v40 = vadd.f32 %v1776_v37, %v962_v38  ;;  %v1164_v38 = vld [vmem:[%s2774_s6 + $0x60] sm:$0xff] }
 0x189   : > { %1175 = vmatpush.msra.mxu3 %v1164_v38 }
 0x18a   : > { %v1012_v41 = vadd.f32 %v1011_v39, %v963_v40  ;;  %v1797_v39 = vunpack.c.h.bf16 %v2419_v26  ;;  %v1163_v40 = vld [vmem:[%s2774_s6 + $0x58] sm:$0xff] }
 0x18b   : > { %1176 = vmatpush.msra.mxu3 %v1163_v40 }
 0x18c   : > { %1087 = vmatmul.f32.vlgmr.msra.gmra.mxu2 %v1012_v41  ;;  %v1162_v41 = vld [vmem:[%s2774_s6 + $0x50] sm:$0xff] }
 0x18d   : > { %1177 = vmatpush.msra.mxu3 %v1162_v41 }
 0x18f   : > { %v964_v43 = vpop.f32.mrf.mxu0 }
 0x190   : > { %v1013_v44 = vpop.f32.mrf.mxu1  ;;  %v965_v45 = vadd.f32 %v1777_v42, %v964_v43 }
 0x192   : > { %v1014_v47 = vadd.f32 %v1013_v44, %v965_v45 }
 0x194   : > { %1090 = vmatmul.f32.gmra.mxu2 %v1014_v47  ;;  %v1161_v47 = vld [vmem:[%s2774_s6 + $0x48] sm:$0xff] }
 0x195   : > { %1178 = vmatpush.msra.mxu3 %v1161_v47 }
 0x197   : > { %v967_v49 = vpop.f32.mrf.mxu0 }
 0x198   : > { %v1016_v50 = vpop.f32.mrf.mxu1  ;;  %v968_v51 = vadd.f32 %v1780_v48, %v967_v49  ;;  %v2449_v49 = vld [vmem:[%s2371_s12 + $0x30] sm:$0xff]  }
 0x19a   : > { %v1017_v52 = vadd.f32 %v1016_v50, %v968_v51  ;;  %v1160_v51 = vld [vmem:[%s2774_s6 + $0x40] sm:$0xff] }
 0x19b   : > { %1179 = vmatpush.msra.mxu3 %v1160_v51 }
 0x19c   : > { %1093 = vmatmul.f32.gmra.mxu2 %v1017_v52  ;;  %v1800_v52 = vunpack.c.l.bf16 %v2449_v49 }
 0x19f   : > { %v969_v54 = vpop.f32.mrf.mxu0 }
 0x1a0   : > { %v1018_v55 = vpop.f32.mrf.mxu1  ;;  %v970_v56 = vadd.f32 %v1781_v53, %v969_v54  ;;  %v1159_v54 = vld [vmem:[%s2774_s6 + $0x38] sm:$0xff] }
 0x1a1   : > { %1180 = vmatpush.msra.mxu3 %v1159_v54 }
 0x1a2   : > { %v1019_v58 = vadd.f32 %v1018_v55, %v970_v56  ;;  %v1158_v55 = vld [vmem:[%s2774_s6 + $0x30] sm:$0xff]  ;;  %v1157_v56 = vld [vmem:[%s2774_s6 + $0x28] sm:$0xff] }
 0x1a3   : > { %1181 = vmatpush.msra.mxu3 %v1158_v55 }
 0x1a4   : > { %1096 = vmatmul.f32.gmra.mxu2 %v1019_v58 }
 0x1a5   : > { %1182 = vmatpush.msra.mxu3 %v1157_v56 }
 0x1a7   : > { %v972_v60 = vpop.f32.mrf.mxu0 }
 0x1a8   : > { %v1021_v61 = vpop.f32.mrf.mxu1  ;;  %v973_v62 = vadd.f32 %v1784_v59, %v972_v60 }
 0x1aa   : > { %v1022_v63 = vadd.f32 %v1021_v61, %v973_v62  ;;  %v1156_v62 = vld [vmem:[%s2774_s6 + $0x20] sm:$0xff] }
 0x1ab   : > { %1183 = vmatpush.msra.mxu3 %v1156_v62 }
 0x1ac   : > { %1099 = vmatmul.f32.gmra.mxu2 %v1022_v63 }
 0x1af   : > { %v974_v1 = vpop.f32.mrf.mxu0 }
 0x1b0   : > { %v1023_v2 = vpop.f32.mrf.mxu1  ;;  %v975_v3 = vadd.f32 %v1785_v0, %v974_v1  ;;  %v1155_v1 = vld [vmem:[%s2774_s6 + $0x18] sm:$0xff] }
 0x1b1   : > { %1184 = vmatpush.msra.mxu3 %v1155_v1 }
 0x1b2   : > { %v1024_v5 = vadd.f32 %v1023_v2, %v975_v3  ;;  %v1801_v2 = vunpack.c.h.bf16 %v2449_v49  ;;  %v1154_v3 = vld [vmem:[%s2774_s6 + $0x10] sm:$0xff] }
 0x1b3   : > { %1185 = vmatpush.msra.mxu3 %v1154_v3 }
 0x1b4   : > { %1102 = vmatmul.f32.gmra.mxu2 %v1024_v5 }
 0x1b7   : > { %v977_v7 = vpop.f32.mrf.mxu0 }
 0x1b8   : > { %v1026_v8 = vpop.f32.mrf.mxu1  ;;  %v978_v9 = vadd.f32 %v1788_v6, %v977_v7 }
 0x1ba   : > { %v1027_v10 = vadd.f32 %v1026_v8, %v978_v9  ;;  %v1153_v9 = vld [vmem:[%s2774_s6 + $0x8] sm:$0xff] }
 0x1bb   : > { %1186 = vmatpush.msra.mxu3 %v1153_v9 }
 0x1bc   : > { %1105 = vmatmul.f32.gmra.mxu2 %v1027_v10  ;;  %v2482_v10 = vld [vmem:[%s2371_s12 + $0x38] sm:$0xff]  }
 0x1bf   : > { %v979_v12 = vpop.f32.mrf.mxu0 }
 0x1c0   : > { %v1028_v13 = vpop.f32.mrf.mxu1  ;;  %v980_v14 = vadd.f32 %v1789_v11, %v979_v12 }
 0x1c2   : > { %v1029_v16 = vadd.f32 %v1028_v13, %v980_v14  ;;  %v1152_v13 = vld [vmem:[%s2774_s6] sm:$0xff]  ;;  %v1804_v14 = vunpack.c.l.bf16 %v2482_v10 }
 0x1c3   : > { %1187 = vmatpush.msra.mxu3 %v1152_v13 }
 0x1c4   : > { %1108 = vmatmul.f32.gmra.mxu2 %v1029_v16 }
 0x1c7   : > { %v982_v18 = vpop.f32.mrf.mxu0 }
 0x1c8   : > { %v1031_v19 = vpop.f32.mrf.mxu1  ;;  %v983_v20 = vadd.f32 %v1792_v17, %v982_v18 }
 0x1ca   : > { %v1032_v21 = vadd.f32 %v1031_v19, %v983_v20 }
 0x1cc   : > { %1111 = vmatmul.f32.gmra.mxu2 %v1032_v21  ;;  %v1805_v21 = vunpack.c.h.bf16 %v2482_v10 }
 0x1cf   : > { %v984_v23 = vpop.f32.mrf.mxu0 }
 0x1d0   : > { %v1033_v24 = vpop.f32.mrf.mxu1  ;;  %v985_v25 = vadd.f32 %v1793_v22, %v984_v23 }
 0x1d2   : > { %v1034_v27 = vadd.f32 %v1033_v24, %v985_v25 }
 0x1d4   : > { %1114 = vmatmul.f32.gmra.mxu2 %v1034_v27 }
 0x1d7   : > { %v987_v31 = vpop.f32.mrf.mxu0 }
 0x1d8   : > { %v1036_v32 = vpop.f32.mrf.mxu1  ;;  %v988_v33 = vadd.f32 %v1796_v28, %v987_v31 }
 0x1da   : > { %v1037_v35 = vadd.f32 %v1036_v32, %v988_v33 }
 0x1dc   : > { %1117 = vmatmul.f32.gmra.mxu2 %v1037_v35 }
 0x1df   : > { %v989_v43 = vpop.f32.mrf.mxu0 }
 0x1e0   : > { %v1038_v44 = vpop.f32.mrf.mxu1  ;;  %v990_v45 = vadd.f32 %v1797_v39, %v989_v43 }
 0x1e2   : > { %v1039_v50 = vadd.f32 %v1038_v44, %v990_v45 }
 0x1e4   : > { %1120 = vmatmul.f32.gmra.mxu2 %v1039_v50 }
 0x1e7   : > { %v992_v58 = vpop.f32.mrf.mxu0 }
 0x1e8   : > { %v1041_v60 = vpop.f32.mrf.mxu1  ;;  %v993_v61 = vadd.f32 %v1800_v52, %v992_v58 }
 0x1ea   : > { %v1042_v63 = vadd.f32 %v1041_v60, %v993_v61 }
 0x1ec   : > { %1123 = vmatmul.f32.gmra.mxu2 %v1042_v63 }
 0x1ef   : > { %v994_v5 = vpop.f32.mrf.mxu0 }
 0x1f0   : > { %v1043_v7 = vpop.f32.mrf.mxu1  ;;  %v995_v8 = vadd.f32 %v1801_v2, %v994_v5 }
 0x1f2   : > { %v1044_v12 = vadd.f32 %v1043_v7, %v995_v8 }
 0x1f4   : > { %1126 = vmatmul.f32.gmra.mxu2 %v1044_v12 }
 0x1f7   : > { %v997_v16 = vpop.f32.mrf.mxu0 }
 0x1f8   : > { %v1046_v18 = vpop.f32.mrf.mxu1  ;;  %v998_v19 = vadd.f32 %v1804_v14, %v997_v16 }
 0x1fa   : > { %v1047_v20 = vadd.f32 %v1046_v18, %v998_v19 }
 0x1fc   : > { %1129 = vmatmul.f32.gmra.mxu2 %v1047_v20 }
 0x1ff   : > { %v999_v23 = vpop.f32.mrf.mxu0 }
 0x200   : > { %v1000_v24 = vadd.f32 %v1805_v21, %v999_v23  ;;  %v1048_v25 = vpop.f32.mrf.mxu1 }
 0x202   : > { %v1049_v27 = vadd.f32 %v1048_v25, %v1000_v24 }
 0x204   : > { %1132 = vmatmul.f32.gmra.mxu2 %v1049_v27 }
 0x20f   : > { %v1088_v30 = vpop.f32.mrf.mxu2 }
 0x210   : > { %v1089_v31 = vadd.f32 %v1975_v29, %v1088_v30 }
 0x212   : > { %v1136_v32 = vmax.f32 %v1089_v31, 0.0 }
 0x214   : > { %1188 = vmatmul.f32.vlgmr.msra.gmra.mxu3 %v1136_v32 }
 0x217   : > { %v1091_v33 = vpop.f32.mrf.mxu2 }
 0x218   : > { %v1092_v34 = vadd.f32 %v1975_v29, %v1091_v33 }
 0x21a   : > { %v1137_v35 = vmax.f32 %v1092_v34, 0.0 }
 0x21c   : > { %1191 = vmatmul.f32.gmra.mxu3 %v1137_v35 }
 0x21f   : > { %v1094_v38 = vpop.f32.mrf.mxu2 }
 0x220   : > { %v1095_v40 = vadd.f32 %v1975_v29, %v1094_v38 }
 0x222   : > { %v1138_v41 = vmax.f32 %v1095_v40, 0.0 }
 0x224   : > { %1194 = vmatmul.f32.gmra.mxu3 %v1138_v41 }
 0x227   : > { %v1097_v43 = vpop.f32.mrf.mxu2 }
 0x228   : > { %v1098_v44 = vadd.f32 %v1975_v29, %v1097_v43  ;;  %v1237_v43 = vld [vmem:[%s2114_s24] sm:$0x1] }
 0x22a   : > { %v1139_v45 = vmax.f32 %v1098_v44, 0.0 }
 0x22c   : > { %1197 = vmatmul.f32.gmra.mxu3 %v1139_v45  ;;  %v1257_v45 = vsub.f32 1.0, %v1237_v43 }
 0x22f   : > { %v1100_v47 = vpop.f32.mrf.mxu2 }
 0x230   : > { %v1101_v50 = vadd.f32 %v1975_v29, %v1100_v47  ;;  %v2501_v47 = vld [vmem:[%s2775_s7] ss:$0 sm:$0xff] }
 0x232   : > { %v1140_v51 = vmax.f32 %v1101_v50, 0.0  ;;  %v2504_v50 = vperm.slane %v1257_v45, 0 }
 0x234   : > { %1200 = vmatmul.f32.gmra.mxu3 %v1140_v51 }
 0x237   : > { %v1103_v54 = vpop.f32.mrf.mxu2 }
 0x238   : > { %v1104_v55 = vadd.f32 %v1975_v29, %v1103_v54  ;;  %v2508_v54 = vld [vmem:[%s2114_s24] ss:$0 sm:$0xff]  ;;  %s2525_s24 = scalar_lea.vmem [#allocation2], %s1657_s29 }
 0x23a   : > { %v1141_v56 = vmax.f32 %v1104_v55, 0.0  ;;  %v1261_v55 = vmul.f32 %v1776_v37, %v2504_v50 }
 0x23c   : > { %1203 = vmatmul.f32.gmra.mxu3 %v1141_v56  ;;  %v1262_v56 = vmul.f32 %v1777_v42, %v2504_v50  ;;  %v1263_v42 = vmul.f32 %v1780_v48, %v2504_v50 }
 0x23f   : > { %v1106_v58 = vpop.f32.mrf.mxu2 }
 0x240   : > { %v1107_v60 = vadd.f32 %v1975_v29, %v1106_v58 }
 0x242   : > { %v1142_v61 = vmax.f32 %v1107_v60, 0.0 }
 0x244   : > { %1206 = vmatmul.f32.gmra.mxu3 %v1142_v61 }
 0x247   : > { %v1109_v62 = vpop.f32.mrf.mxu2 }
 0x248   : > { %v1110_v63 = vadd.f32 %v1975_v29, %v1109_v62 }
 0x24a   : > { %v1143_v1 = vmax.f32 %v1110_v63, 0.0 }
 0x24c   : > { %1209 = vmatmul.f32.gmra.mxu3 %v1143_v1 }
 0x24f   : > { %v1112_v3 = vpop.f32.mrf.mxu2 }
 0x250   : > { %v1113_v5 = vadd.f32 %v1975_v29, %v1112_v3 }
 0x252   : > { %v1144_v7 = vmax.f32 %v1113_v5, 0.0  ;;  %v1264_v5 = vmul.f32 %v1781_v53, %v2504_v50  ;;  %v1265_v53 = vmul.f32 %v1784_v59, %v2504_v50 }
 0x254   : > { %1212 = vmatmul.f32.gmra.mxu3 %v1144_v7 }
 0x257   : > { %v1115_v8 = vpop.f32.mrf.mxu2 }
 0x258   : > { %v1116_v9 = vadd.f32 %v1975_v29, %v1115_v8 }
 0x25a   : > { %v1145_v12 = vmax.f32 %v1116_v9, 0.0 }
 0x25c   : > { %1215 = vmatmul.f32.gmra.mxu3 %v1145_v12 }
 0x25f   : > { %v1118_v13 = vpop.f32.mrf.mxu2 }
 0x260   : > { %v1119_v16 = vadd.f32 %v1975_v29, %v1118_v13 }
 0x262   : > { %v1146_v18 = vmax.f32 %v1119_v16, 0.0 }
 0x264   : > { %1218 = vmatmul.f32.gmra.mxu3 %v1146_v18 }
 0x267   : > { %v1121_v19 = vpop.f32.mrf.mxu2 }
 0x268   : > { %v1122_v20 = vadd.f32 %v1975_v29, %v1121_v19  ;;  %v1266_v19 = vmul.f32 %v1785_v0, %v2504_v50  ;;  %v1267_v0 = vmul.f32 %v1788_v6, %v2504_v50 }
 0x26a   : > { %v1147_v23 = vmax.f32 %v1122_v20, 0.0 }
 0x26c   : > { %1221 = vmatmul.f32.gmra.mxu3 %v1147_v23 }
 0x26f   : > { %v1124_v24 = vpop.f32.mrf.mxu2 }
 0x270   : > { %v1125_v25 = vadd.f32 %v1975_v29, %v1124_v24 }
 0x272   : > { %v1148_v27 = vmax.f32 %v1125_v25, 0.0 }
 0x274   : > { %1224 = vmatmul.f32.gmra.mxu3 %v1148_v27 }
 0x277   : > { %v1127_v30 = vpop.f32.mrf.mxu2 }
 0x278   : > { %v1128_v31 = vadd.f32 %v1975_v29, %v1127_v30 }
 0x27a   : > { %v1149_v32 = vmax.f32 %v1128_v31, 0.0 }
 0x27c   : > { %1227 = vmatmul.f32.gmra.mxu3 %v1149_v32  ;;  %v1268_v32 = vmul.f32 %v1789_v11, %v2504_v50  ;;  %v1269_v11 = vmul.f32 %v1792_v17, %v2504_v50 }
 0x27f   : > { %v1130_v33 = vpop.f32.mrf.mxu2 }
 0x280   : > { %v1131_v34 = vadd.f32 %v1975_v29, %v1130_v33 }
 0x282   : > { %v1150_v35 = vmax.f32 %v1131_v34, 0.0 }
 0x284   : > { %1230 = vmatmul.f32.gmra.mxu3 %v1150_v35 }
 0x287   : > { %v1133_v38 = vpop.f32.mrf.mxu2 }
 0x288   : > { %v1134_v40 = vadd.f32 %v1975_v29, %v1133_v38 }
 0x28a   : > { %v1151_v41 = vmax.f32 %v1134_v40, 0.0 }
 0x28c   : > { %1233 = vmatmul.f32.gmra.mxu3 %v1151_v41 }
 0x297   : > { %v1189_v44 = vpop.f32.mrf.mxu3 }
 0x298   : > { %v1190_v51 = vadd.f32 %v2501_v47, %v1189_v44  ;;  %v1270_v44 = vmul.f32 %v1793_v22, %v2504_v50  ;;  %v1271_v22 = vmul.f32 %v1796_v28, %v2504_v50 }
 0x29a   : > { %v1241_v58 = vmul.f32 %v2508_v54, %v1190_v51 }
 0x29c   : > { %v2519_v62 = vadd.f32 %v1261_v55, %v1241_v58 }
 0x29f   : > { %v1192_v29 = vpop.f32.mrf.mxu3 }
 0x2a0   : > { %v1193_v60 = vadd.f32 %v2501_v47, %v1192_v29 }
 0x2a2   : > { %v1242_v61 = vmul.f32 %v2508_v54, %v1193_v60 }
 0x2a4   : > { %v2521_v63 = vadd.f32 %v1262_v56, %v1242_v61  ;;  %v1272_v61 = vmul.f32 %v1797_v39, %v2504_v50  ;;  %v1273_v39 = vmul.f32 %v1800_v52, %v2504_v50 }
 0x2a6   : > { %v1809_v1 = vpack.c.bf16 %v2521_v63, %v2519_v62 }
 0x2a7   : > { %v1195_v3 = vpop.f32.mrf.mxu3 }
 0x2a8   : > { %1810 = vst [vmem:[%s2525_s24] sm:$0xff] %v1809_v1   ;;  %v1196_v36 = vadd.f32 %v2501_v47, %v1195_v3 }
 0x2aa   : > { %v1243_v7 = vmul.f32 %v2508_v54, %v1196_v36 }
 0x2ac   : > { %v2538_v12 = vadd.f32 %v1263_v42, %v1243_v7 }
 0x2af   : > { %v1198_v37 = vpop.f32.mrf.mxu3 }
 0x2b0   : > { %v1199_v8 = vadd.f32 %v2501_v47, %v1198_v37 }
 0x2b2   : > { %v1244_v9 = vmul.f32 %v2508_v54, %v1199_v8  ;;  %v1274_v8 = vmul.f32 %v1801_v2, %v2504_v50  ;;  %v1275_v2 = vmul.f32 %v1804_v14, %v2504_v50 }
 0x2b4   : > { %v2540_v13 = vadd.f32 %v1264_v5, %v1244_v9 }
 0x2b6   : > { %v1814_v16 = vpack.c.bf16 %v2540_v13, %v2538_v12 }
 0x2b7   : > { %v1201_v18 = vpop.f32.mrf.mxu3 }
 0x2b8   : > { %1868 = vst [vmem:[%s2525_s24 + $0x8] sm:$0xff] %v1814_v16   ;;  %v1202_v48 = vadd.f32 %v2501_v47, %v1201_v18 }
 0x2ba   : > { %v1245_v20 = vmul.f32 %v2508_v54, %v1202_v48 }
 0x2bc   : > { %v2555_v25 = vadd.f32 %v1265_v53, %v1245_v20  ;;  %v1276_v20 = vmul.f32 %v1805_v21, %v2504_v50 }
 0x2bf   : > { %v1204_v46 = vpop.f32.mrf.mxu3 }
 0x2c0   : > { %v1205_v23 = vadd.f32 %v2501_v47, %v1204_v46 }
 0x2c2   : > { %v1246_v24 = vmul.f32 %v2508_v54, %v1205_v23 }
 0x2c4   : > { %v2557_v27 = vadd.f32 %v1266_v19, %v1246_v24 }
 0x2c6   : > { %v1819_v30 = vpack.c.bf16 %v2557_v27, %v2555_v25 }
 0x2c7   : > { %v1207_v31 = vpop.f32.mrf.mxu3 }
 0x2c8   : > { %1869 = vst [vmem:[%s2525_s24 + $0x10] sm:$0xff] %v1819_v30   ;;  %v1208_v59 = vadd.f32 %v2501_v47, %v1207_v31 }
 0x2ca   : > { %v1247_v33 = vmul.f32 %v2508_v54, %v1208_v59 }
 0x2cc   : > { %v2572_v38 = vadd.f32 %v1267_v0, %v1247_v33 }
 0x2cf   : > { %v1210_v57 = vpop.f32.mrf.mxu3 }
 0x2d0   : > { %v1211_v34 = vadd.f32 %v2501_v47, %v1210_v57 }
 0x2d2   : > { %v1248_v35 = vmul.f32 %v2508_v54, %v1211_v34 }
 0x2d4   : > { %v2574_v40 = vadd.f32 %v1268_v32, %v1248_v35 }
 0x2d6   : > { %v1824_v41 = vpack.c.bf16 %v2574_v40, %v2572_v38 }
 0x2d7   : > { %v1213_v43 = vpop.f32.mrf.mxu3 }
 0x2d8   : > { %1870 = vst [vmem:[%s2525_s24 + $0x18] sm:$0xff] %v1824_v41   ;;  %v1214_v6 = vadd.f32 %v2501_v47, %v1213_v43 }
 0x2da   : > { %v1249_v45 = vmul.f32 %v2508_v54, %v1214_v6 }
 0x2dc   : > { %v2589_v55 = vadd.f32 %v1269_v11, %v1249_v45 }
 0x2df   : > { %v1216_v4 = vpop.f32.mrf.mxu3 }
 0x2e0   : > { %v1217_v51 = vadd.f32 %v2501_v47, %v1216_v4 }
 0x2e2   : > { %v1250_v29 = vmul.f32 %v2508_v54, %v1217_v51 }
 0x2e4   : > { %v2591_v56 = vadd.f32 %v1270_v44, %v1250_v29 }
 0x2e6   : > { %v1829_v58 = vpack.c.bf16 %v2591_v56, %v2589_v55 }
 0x2e7   : > { %v1219_v60 = vpop.f32.mrf.mxu3 }
 0x2e8   : > { %1871 = vst [vmem:[%s2525_s24 + $0x20] sm:$0xff] %v1829_v58   ;;  %v1220_v17 = vadd.f32 %v2501_v47, %v1219_v60 }
 0x2ea   : > { %v1251_v1 = vmul.f32 %v2508_v54, %v1220_v17 }
 0x2ec   : > { %v2606_v37 = vadd.f32 %v1271_v22, %v1251_v1 }
 0x2ef   : > { %v1222_v15 = vpop.f32.mrf.mxu3 }
 0x2f0   : > { %v1223_v3 = vadd.f32 %v2501_v47, %v1222_v15 }
 0x2f2   : > { %v1252_v36 = vmul.f32 %v2508_v54, %v1223_v3 }
 0x2f4   : > { %v2608_v42 = vadd.f32 %v1272_v61, %v1252_v36 }
 0x2f6   : > { %v1834_v5 = vpack.c.bf16 %v2608_v42, %v2606_v37 }
 0x2f7   : > { %v1225_v7 = vpop.f32.mrf.mxu3 }
 0x2f8   : > { %1872 = vst [vmem:[%s2525_s24 + $0x28] sm:$0xff] %v1834_v5   ;;  %v1226_v28 = vadd.f32 %v2501_v47, %v1225_v7 }
 0x2fa   : > { %v1253_v9 = vmul.f32 %v2508_v54, %v1226_v28 }
 0x2fc   : > { %v2623_v48 = vadd.f32 %v1273_v39, %v1253_v9 }
 0x2ff   : > { %v1228_v26 = vpop.f32.mrf.mxu3 }
 0x300   : > { %v1229_v16 = vadd.f32 %v2501_v47, %v1228_v26 }
 0x302   : > { %v1254_v18 = vmul.f32 %v2508_v54, %v1229_v16 }
 0x304   : > { %v2625_v46 = vadd.f32 %v1274_v8, %v1254_v18 }
 0x306   : > { %v1839_v53 = vpack.c.bf16 %v2625_v46, %v2623_v48 }
 0x307   : > { %v1231_v19 = vpop.f32.mrf.mxu3 }
 0x308   : > { %1873 = vst [vmem:[%s2525_s24 + $0x30] sm:$0xff] %v1839_v53   ;;  %v1232_v52 = vadd.f32 %v2501_v47, %v1231_v19 }
 0x30a   : > { %v1255_v23 = vmul.f32 %v2508_v54, %v1232_v52 }
 0x30c   : > { %v2640_v31 = vadd.f32 %v1275_v2, %v1255_v23 }
 0x30f   : > { %v1234_v49 = vpop.f32.mrf.mxu3 }
 0x310   : > { %v1235_v24 = vadd.f32 %v2501_v47, %v1234_v49 }
 0x312   : > { %v1256_v30 = vmul.f32 %v2508_v54, %v1235_v24 }
 0x314   : > { %v2642_v59 = vadd.f32 %v1276_v20, %v1256_v30  ;;  %1333 = sbr.rel (%p1658_p11) target bundleno = 985 (0x3d9), region = 68 }
 0x316   : > { %v1844_v57 = vpack.c.bf16 %v2642_v59, %v2640_v31 }
 0x318   : > { %1874 = vst [vmem:[%s2525_s24 + $0x38] sm:$0xff] %v1844_v57  }
 0x319   : > { %v1349_v10 = vld [vmem:[%s2776_s8 + $0x78] sm:$0xff]  ;;  %v1348_v14 = vld [vmem:[%s2776_s8 + $0x70] sm:$0xff]  ;;  %v1347_v21 = vld [vmem:[%s2776_s8 + $0x68] sm:$0xff]  ;;  %vm1420_vm1 = vcmask 261120  }
 0x31a   : > { %1888 = vmatpush.msra.mxu2 %v1349_v10  ;;  %1889 = vmatpush.msra.mxu3 %v1349_v10  ;;  %v1346_v47 = vld [vmem:[%s2776_s8 + $0x60] sm:$0xff]  ;;  %v1345_v50 = vld [vmem:[%s2776_s8 + $0x58] sm:$0xff]  ;;  %v1344_v54 = vld [vmem:[%s2776_s8 + $0x50] sm:$0xff] }
 0x31b   : > { %1354 = vmatpush.msra.mxu0 %v1349_v10  ;;  %1887 = vmatpush.msra.mxu1 %v1349_v10  ;;  %v1343_v0 = vld [vmem:[%s2776_s8 + $0x48] sm:$0xff]  ;;  %v1342_v32 = vld [vmem:[%s2776_s8 + $0x40] sm:$0xff]  ;;  %v1341_v33 = vld [vmem:[%s2776_s8 + $0x38] sm:$0xff] }
 0x31c   : > { %1891 = vmatpush.msra.mxu2 %v1348_v14  ;;  %1892 = vmatpush.msra.mxu3 %v1348_v14  ;;  %v1340_v34 = vld [vmem:[%s2776_s8 + $0x30] sm:$0xff]  ;;  %v1339_v35 = vld [vmem:[%s2776_s8 + $0x28] sm:$0xff]  ;;  %v1338_v41 = vld [vmem:[%s2776_s8 + $0x20] sm:$0xff] }
 0x31d   : > { %1355 = vmatpush.msra.mxu0 %v1348_v14  ;;  %1890 = vmatpush.msra.mxu1 %v1348_v14  ;;  %v1337_v43 = vld [vmem:[%s2776_s8 + $0x18] sm:$0xff]  ;;  %v1336_v6 = vld [vmem:[%s2776_s8 + $0x10] sm:$0xff]  ;;  %v1335_v4 = vld [vmem:[%s2776_s8 + $0x8] sm:$0xff] }
 0x31e   : > { %1894 = vmatpush.msra.mxu2 %v1347_v21  ;;  %1895 = vmatpush.msra.mxu3 %v1347_v21  ;;  %v1334_v11 = vld [vmem:[%s2776_s8] sm:$0xff] }
 0x31f   : > { %1356 = vmatpush.msra.mxu0 %v1347_v21  ;;  %1893 = vmatpush.msra.mxu1 %v1347_v21 }
 0x320   : > { %1897 = vmatpush.msra.mxu2 %v1346_v47  ;;  %1898 = vmatpush.msra.mxu3 %v1346_v47 }
 0x321   : > { %1357 = vmatpush.msra.mxu0 %v1346_v47  ;;  %1896 = vmatpush.msra.mxu1 %v1346_v47 }
 0x322   : > { %1900 = vmatpush.msra.mxu2 %v1345_v50  ;;  %1901 = vmatpush.msra.mxu3 %v1345_v50 }
 0x323   : > { %1358 = vmatpush.msra.mxu0 %v1345_v50  ;;  %1899 = vmatpush.msra.mxu1 %v1345_v50 }
 0x324   : > { %1903 = vmatpush.msra.mxu2 %v1344_v54  ;;  %1904 = vmatpush.msra.mxu3 %v1344_v54 }
 0x325   : > { %1359 = vmatpush.msra.mxu0 %v1344_v54  ;;  %1902 = vmatpush.msra.mxu1 %v1344_v54 }
 0x326   : > { %1906 = vmatpush.msra.mxu2 %v1343_v0  ;;  %1907 = vmatpush.msra.mxu3 %v1343_v0 }
 0x327   : > { %1360 = vmatpush.msra.mxu0 %v1343_v0  ;;  %1905 = vmatpush.msra.mxu1 %v1343_v0 }
 0x328   : > { %1909 = vmatpush.msra.mxu2 %v1342_v32  ;;  %1910 = vmatpush.msra.mxu3 %v1342_v32 }
 0x329   : > { %1361 = vmatpush.msra.mxu0 %v1342_v32  ;;  %1908 = vmatpush.msra.mxu1 %v1342_v32 }
 0x32a   : > { %1912 = vmatpush.msra.mxu2 %v1341_v33  ;;  %1913 = vmatpush.msra.mxu3 %v1341_v33 }
 0x32b   : > { %1362 = vmatpush.msra.mxu0 %v1341_v33  ;;  %1911 = vmatpush.msra.mxu1 %v1341_v33 }
 0x32c   : > { %1915 = vmatpush.msra.mxu2 %v1340_v34  ;;  %1916 = vmatpush.msra.mxu3 %v1340_v34 }
 0x32d   : > { %1363 = vmatpush.msra.mxu0 %v1340_v34  ;;  %1914 = vmatpush.msra.mxu1 %v1340_v34 }
 0x32e   : > { %1918 = vmatpush.msra.mxu2 %v1339_v35  ;;  %1919 = vmatpush.msra.mxu3 %v1339_v35 }
 0x32f   : > { %1364 = vmatpush.msra.mxu0 %v1339_v35  ;;  %1917 = vmatpush.msra.mxu1 %v1339_v35 }
 0x330   : > { %1921 = vmatpush.msra.mxu2 %v1338_v41  ;;  %1922 = vmatpush.msra.mxu3 %v1338_v41 }
 0x331   : > { %1365 = vmatpush.msra.mxu0 %v1338_v41  ;;  %1920 = vmatpush.msra.mxu1 %v1338_v41 }
 0x332   : > { %1924 = vmatpush.msra.mxu2 %v1337_v43  ;;  %1925 = vmatpush.msra.mxu3 %v1337_v43 }
 0x333   : > { %1366 = vmatpush.msra.mxu0 %v1337_v43  ;;  %1923 = vmatpush.msra.mxu1 %v1337_v43 }
 0x334   : > { %1927 = vmatpush.msra.mxu2 %v1336_v6  ;;  %1928 = vmatpush.msra.mxu3 %v1336_v6 }
 0x335   : > { %1367 = vmatpush.msra.mxu0 %v1336_v6  ;;  %1926 = vmatpush.msra.mxu1 %v1336_v6 }
 0x336   : > { %1930 = vmatpush.msra.mxu2 %v1335_v4  ;;  %1931 = vmatpush.msra.mxu3 %v1335_v4 }
 0x337   : > { %1368 = vmatpush.msra.mxu0 %v1335_v4  ;;  %1929 = vmatpush.msra.mxu1 %v1335_v4 }
 0x338   : > { %1933 = vmatpush.msra.mxu2 %v1334_v11  ;;  %1934 = vmatpush.msra.mxu3 %v1334_v11 }
 0x339   : > { %1394 = vmatmul.f32.vlgmr.msra.gmra.mxu2 %v2589_v55  ;;  %1406 = vmatmul.f32.vlgmr.msra.gmra.mxu3 %v2623_v48 }
 0x33a   : > { %1369 = vmatpush.msra.mxu0 %v1334_v11  ;;  %1932 = vmatpush.msra.mxu1 %v1334_v11 }
 0x33b   : > { %1370 = vmatmul.f32.vlgmr.msra.gmra.mxu0 %v2519_v62  ;;  %1382 = vmatmul.f32.vlgmr.msra.gmra.mxu1 %v2555_v25  ;;  %v1978_v62 = vld [vmem:[%s2777_s9] ss:$0 sm:$0xff] }
 0x341   : > { %1397 = vmatmul.f32.gmra.mxu2 %v2591_v56  ;;  %1409 = vmatmul.f32.gmra.mxu3 %v2625_v46 }
 0x343   : > { %1373 = vmatmul.f32.gmra.mxu0 %v2521_v63  ;;  %1385 = vmatmul.f32.gmra.mxu1 %v2557_v27 }
 0x349   : > { %1400 = vmatmul.f32.gmra.mxu2 %v2606_v37  ;;  %1412 = vmatmul.f32.gmra.mxu3 %v2640_v31 }
 0x34b   : > { %1376 = vmatmul.f32.gmra.mxu0 %v2538_v12  ;;  %1388 = vmatmul.f32.gmra.mxu1 %v2572_v38 }
 0x351   : > { %1403 = vmatmul.f32.gmra.mxu2 %v2608_v42  ;;  %1415 = vmatmul.f32.gmra.mxu3 %v2642_v59 }
 0x353   : > { %1379 = vmatmul.f32.gmra.mxu0 %v2540_v13  ;;  %1391 = vmatmul.f32.gmra.mxu1 %v2574_v40 }
 0x3b8   : > { %v1371_v63 = vpop.f32.mrf.mxu0  ;;  %v1383_v12 = vpop.f32.mrf.mxu1 }
 0x3b9   : > { %v1372_v13 = vadd.f32 %v1978_v62, %v1371_v63  ;;  %v1384_v25 = vadd.f32 %v1978_v62, %v1383_v12 }
 0x3bb   : > { %1421 = vst.msk [vmem:[%s2719_s26] sm:$0xff] %vm1420_vm1, %v1372_v13 }
 0x3bc   : > { %1425 = vst.msk [vmem:[%s2719_s26 + $0x20] sm:$0xff] %vm1420_vm1, %v1384_v25  ;;  %v1395_v27 = vpop.f32.mrf.mxu2  ;;  %v1407_v38 = vpop.f32.mrf.mxu3 }
 0x3bd   : > { %v1396_v40 = vadd.f32 %v1978_v62, %v1395_v27  ;;  %v1408_v44 = vadd.f32 %v1978_v62, %v1407_v38 }
 0x3bf   : > { %1429 = vst.msk [vmem:[%s2719_s26 + $0x40] sm:$0xff] %vm1420_vm1, %v1396_v40 }
 0x3c0   : > { %1433 = vst.msk [vmem:[%s2719_s26 + $0x60] sm:$0xff] %vm1420_vm1, %v1408_v44  ;;  %v1374_v45 = vpop.f32.mrf.mxu0  ;;  %v1386_v51 = vpop.f32.mrf.mxu1 }
 0x3c1   : > { %v1375_v29 = vadd.f32 %v1978_v62, %v1374_v45  ;;  %v1387_v55 = vadd.f32 %v1978_v62, %v1386_v51 }
 0x3c3   : > { %1422 = vst.msk [vmem:[%s2719_s26 + $0x8] sm:$0xff] %vm1420_vm1, %v1375_v29 }
 0x3c4   : > { %1426 = vst.msk [vmem:[%s2719_s26 + $0x28] sm:$0xff] %vm1420_vm1, %v1387_v55  ;;  %v1398_v56 = vpop.f32.mrf.mxu2  ;;  %v1410_v58 = vpop.f32.mrf.mxu3 }
 0x3c5   : > { %v1399_v60 = vadd.f32 %v1978_v62, %v1398_v56  ;;  %v1411_v17 = vadd.f32 %v1978_v62, %v1410_v58 }
 0x3c7   : > { %1430 = vst.msk [vmem:[%s2719_s26 + $0x48] sm:$0xff] %vm1420_vm1, %v1399_v60 }
 0x3c8   : > { %1434 = vst.msk [vmem:[%s2719_s26 + $0x68] sm:$0xff] %vm1420_vm1, %v1411_v17  ;;  %v1377_v15 = vpop.f32.mrf.mxu0  ;;  %v1389_v22 = vpop.f32.mrf.mxu1 }
 0x3c9   : > { %v1378_v61 = vadd.f32 %v1978_v62, %v1377_v15  ;;  %v1390_v1 = vadd.f32 %v1978_v62, %v1389_v22 }
 0x3cb   : > { %1423 = vst.msk [vmem:[%s2719_s26 + $0x10] sm:$0xff] %vm1420_vm1, %v1378_v61 }
 0x3cc   : > { %1427 = vst.msk [vmem:[%s2719_s26 + $0x30] sm:$0xff] %vm1420_vm1, %v1390_v1  ;;  %v1401_v3 = vpop.f32.mrf.mxu2  ;;  %v1413_v36 = vpop.f32.mrf.mxu3 }
 0x3cd   : > { %v1402_v37 = vadd.f32 %v1978_v62, %v1401_v3  ;;  %v1414_v42 = vadd.f32 %v1978_v62, %v1413_v36 }
 0x3cf   : > { %1431 = vst.msk [vmem:[%s2719_s26 + $0x50] sm:$0xff] %vm1420_vm1, %v1402_v37 }
 0x3d0   : > { %1435 = vst.msk [vmem:[%s2719_s26 + $0x70] sm:$0xff] %vm1420_vm1, %v1414_v42  ;;  %v1380_v5 = vpop.f32.mrf.mxu0  ;;  %v1392_v7 = vpop.f32.mrf.mxu1 }
 0x3d1   : > { %v1381_v28 = vadd.f32 %v1978_v62, %v1380_v5  ;;  %v1393_v26 = vadd.f32 %v1978_v62, %v1392_v7 }
 0x3d3   : > { %1424 = vst.msk [vmem:[%s2719_s26 + $0x18] sm:$0xff] %vm1420_vm1, %v1381_v28 }
 0x3d4   : > { %1428 = vst.msk [vmem:[%s2719_s26 + $0x38] sm:$0xff] %vm1420_vm1, %v1393_v26  ;;  %v1404_v39 = vpop.f32.mrf.mxu2  ;;  %v1416_v8 = vpop.f32.mrf.mxu3 }
 0x3d5   : > { %v1405_v9 = vadd.f32 %v1978_v62, %v1404_v39  ;;  %v1417_v16 = vadd.f32 %v1978_v62, %v1416_v8 }
 0x3d7   : > { %1432 = vst.msk [vmem:[%s2719_s26 + $0x58] sm:$0xff] %vm1420_vm1, %v1405_v9 }
 0x3d8   : > { %1436 = vst.msk [vmem:[%s2719_s26 + $0x78] sm:$0xff] %vm1420_vm1, %v1417_v16 }
 0x3d9 PF: > { %s20_s17 = sadd.s32 1, %s2017_s17   ;;  %s2781_s13 = smov %s2009_s15 }
 0x3da   : > { %p17_p12 = scmp.ge.s32.totalorder %s20_s17, 8   ;;  %s2782_s14 = smov %s2013_s16 }
 0x3db   : > { %s2783_s15 = smov %s2786_s18  ;;  %s2784_s16 = smov %s2790_s19 }
 0x3dc   :  { %19 = sbr.rel (!%p17_p12) target bundleno = 3 (0x3), region = 99 }

</bundles_post_ra>
